<compile_context>
chip_gen: v7x
topology: tpu7x:2x2x1
jax: 0.10.0
libtpu: 0.0.40
codegen_flags: <defaults>
</compile_context>

<pallas_src>
import functools
import math

import jax
import jax.numpy as jnp
from jax.experimental import pallas as pl
from jax.experimental.pallas import tpu as pltpu


def encoder_layer_kernel(
    x_ref, mask_ref,
    ln1_g_ref, ln1_b_ref,
    wq_ref, bq_ref, wk_ref, bk_ref, wv_ref, bv_ref, wo_ref, bo_ref,
    ln2_g_ref, ln2_b_ref,
    w1_ref, b1_ref, w2_ref, b2_ref,
    out_ref,
    *, num_heads, eps,
):
    x = x_ref[0]          # (S, D) current batch element
    m = mask_ref[0]       # (1, S) float mask: 1.0 = attend, 0.0 = masked
    S, D = x.shape
    d_k = D // num_heads

    def layer_norm(v, gamma, beta):
        # torch semantics: unbiased std (N-1 divisor), divide by (std + eps)
        mean = jnp.mean(v, axis=-1, keepdims=True)
        centered = v - mean
        var = jnp.sum(centered * centered, axis=-1, keepdims=True) / (D - 1)
        std = jnp.sqrt(var)
        return gamma * centered / (std + eps) + beta

    # ---- sublayer 0: pre-norm -> multi-head self-attention -> residual ----
    y = layer_norm(x, ln1_g_ref[...], ln1_b_ref[...])

    q = jnp.dot(y, wq_ref[...], preferred_element_type=jnp.float32) + bq_ref[...]
    k = jnp.dot(y, wk_ref[...], preferred_element_type=jnp.float32) + bk_ref[...]
    v = jnp.dot(y, wv_ref[...], preferred_element_type=jnp.float32) + bv_ref[...]

    inv_sqrt_dk = 1.0 / math.sqrt(d_k)
    neg_big = jnp.float32(-1e9)
    head_outs = []
    for h in range(num_heads):                       # static unroll, num_heads is small
        lo = h * d_k
        qh = q[:, lo:lo + d_k]                       # (S, d_k)
        kh = k[:, lo:lo + d_k]
        vh = v[:, lo:lo + d_k]
        scores = jnp.dot(qh, kh.T, preferred_element_type=jnp.float32) * inv_sqrt_dk
        scores = jnp.where(m > 0.0, scores, neg_big)             # (1,S) broadcasts over rows
        scores = scores - jnp.max(scores, axis=-1, keepdims=True)
        p = jnp.exp(scores)
        p = p / jnp.sum(p, axis=-1, keepdims=True)
        head_outs.append(jnp.dot(p, vh, preferred_element_type=jnp.float32))
    attn = jnp.concatenate(head_outs, axis=-1)                   # (S, D)
    attn = jnp.dot(attn, wo_ref[...], preferred_element_type=jnp.float32) + bo_ref[...]

    # TODO(synk): nn.Dropout is identity at inference; stochastic dropout not implemented.
    x1 = x + attn

    # ---- sublayer 1: pre-norm -> position-wise feed-forward -> residual ----
    y2 = layer_norm(x1, ln2_g_ref[...], ln2_b_ref[...])
    hid = jnp.dot(y2, w1_ref[...], preferred_element_type=jnp.float32) + b1_ref[...]
    hid = jnp.maximum(hid, 0.0)
    ffn = jnp.dot(hid, w2_ref[...], preferred_element_type=jnp.float32) + b2_ref[...]

    out_ref[0] = (x1 + ffn).astype(out_ref.dtype)


def encoder_layer_forward(x, mask, params, *, num_heads, eps=1e-6):
    """x: (B, S, D) f32; mask: (B, 1, S) f32 (1 = attend, 0 = masked)."""
    B, S, D = x.shape
    d_ff = params["w1"].shape[1]
    assert D % num_heads == 0

    kernel = functools.partial(encoder_layer_kernel, num_heads=num_heads, eps=eps)

    def const(shape):
        # Parameter block: same (whole-array) block at every grid step.
        return pl.BlockSpec(shape, lambda b: (0, 0))

    in_specs = [
        pl.BlockSpec((1, S, D), lambda b: (b, 0, 0)),   # x
        pl.BlockSpec((1, 1, S), lambda b: (b, 0, 0)),   # mask
        const((1, D)), const((1, D)),                   # ln1 gamma / beta
        const((D, D)), const((1, D)),                   # Wq, bq
        const((D, D)), const((1, D)),                   # Wk, bk
        const((D, D)), const((1, D)),                   # Wv, bv
        const((D, D)), const((1, D)),                   # Wo, bo
        const((1, D)), const((1, D)),                   # ln2 gamma / beta
        const((D, d_ff)), const((1, d_ff)),             # W1, b1
        const((d_ff, D)), const((1, D)),                # W2, b2
    ]

    return pl.pallas_call(
        kernel,
        out_shape=jax.ShapeDtypeStruct((B, S, D), x.dtype),
        grid=(B,),
        in_specs=in_specs,
        out_specs=pl.BlockSpec((1, S, D), lambda b: (b, 0, 0)),
        compiler_params=pltpu.CompilerParams(
            dimension_semantics=("parallel",),
        ),
    )(
        x, mask,
        params["ln1_g"], params["ln1_b"],
        params["wq"], params["bq"], params["wk"], params["bk"],
        params["wv"], params["bv"], params["wo"], params["bo"],
        params["ln2_g"], params["ln2_b"],
        params["w1"], params["b1"], params["w2"], params["b2"],
    )


def encoder_layer_ref(x, mask, params, *, num_heads, eps=1e-6):
    """Pure-JAX reference with identical (torch-matching) semantics."""
    B, S, D = x.shape
    d_k = D // num_heads

    def layer_norm(v, g, b):
        mean = jnp.mean(v, axis=-1, keepdims=True)
        c = v - mean
        var = jnp.sum(c * c, axis=-1, keepdims=True) / (D - 1)
        std = jnp.sqrt(var)
        return g * c / (std + eps) + b

    y = layer_norm(x, params["ln1_g"], params["ln1_b"])
    q = y @ params["wq"] + params["bq"]
    k = y @ params["wk"] + params["bk"]
    v = y @ params["wv"] + params["bv"]

    def split(t):
        return t.reshape(B, S, num_heads, d_k).transpose(0, 2, 1, 3)

    qh, kh, vh = split(q), split(k), split(v)
    scores = jnp.einsum("bhqd,bhkd->bhqk", qh, kh) / math.sqrt(d_k)
    m = mask[:, None, :, :]                    # (B, 1, 1, S)
    scores = jnp.where(m > 0.0, scores, -1e9)
    p = jax.nn.softmax(scores, axis=-1)
    o = jnp.einsum("bhqk,bhkd->bhqd", p, vh).transpose(0, 2, 1, 3).reshape(B, S, D)
    attn = o @ params["wo"] + params["bo"]
    x1 = x + attn

    y2 = layer_norm(x1, params["ln2_g"], params["ln2_b"])
    ffn = jnp.maximum(y2 @ params["w1"] + params["b1"], 0.0) @ params["w2"] + params["b2"]
    return x1 + ffn


if __name__ == "__main__":
    # Small shapes consistent with the module (lane-dense d_model).
    B, S, D = 2, 8, 128
    H, d_ff = 4, 256

    key = jax.random.PRNGKey(0)
    keys = jax.random.split(key, 14)

    def nrm(k, shape, scale=0.05):
        return jax.random.normal(k, shape, dtype=jnp.float32) * scale

    params = {
        "ln1_g": jnp.ones((1, D), jnp.float32),
        "ln1_b": jnp.zeros((1, D), jnp.float32),
        "wq": nrm(keys[0], (D, D)), "bq": nrm(keys[1], (1, D)),
        "wk": nrm(keys[2], (D, D)), "bk": nrm(keys[3], (1, D)),
        "wv": nrm(keys[4], (D, D)), "bv": nrm(keys[5], (1, D)),
        "wo": nrm(keys[6], (D, D)), "bo": nrm(keys[7], (1, D)),
        "ln2_g": jnp.ones((1, D), jnp.float32),
        "ln2_b": jnp.zeros((1, D), jnp.float32),
        "w1": nrm(keys[8], (D, d_ff)), "b1": nrm(keys[9], (1, d_ff)),
        "w2": nrm(keys[10], (d_ff, D)), "b2": nrm(keys[11], (1, D)),
    }

    x = jax.random.normal(keys[12], (B, S, D), dtype=jnp.float32)
    # Mask: batch 0 fully visible; batch 1 masks out the last two key positions.
    mask = jnp.ones((B, 1, S), jnp.float32)
    mask = mask.at[1, 0, S - 2:].set(0.0)

    out = encoder_layer_forward(x, mask, params, num_heads=H)
    out = jax.block_until_ready(out)

    ref = encoder_layer_ref(x, mask, params, num_heads=H)
    assert out.shape == (B, S, D)
    max_err = float(jnp.max(jnp.abs(out - ref)))
    assert jnp.allclose(out, ref, atol=1e-4, rtol=1e-4), f"mismatch vs reference: {max_err}"

    print("KERNEL_OK")
</pallas_src>

<mosaic_0001>
module attributes {stable_mosaic.version = 11 : i64} {
  func.func @encoder_layer_kernel(%arg0: i32, %arg1: memref<1x8x128xf32, #tpu.memory_space<vmem>>, %arg2: memref<1x1x8xf32, #tpu.memory_space<vmem>>, %arg3: memref<1x128xf32, #tpu.memory_space<vmem>>, %arg4: memref<1x128xf32, #tpu.memory_space<vmem>>, %arg5: memref<128x128xf32, #tpu.memory_space<vmem>>, %arg6: memref<1x128xf32, #tpu.memory_space<vmem>>, %arg7: memref<128x128xf32, #tpu.memory_space<vmem>>, %arg8: memref<1x128xf32, #tpu.memory_space<vmem>>, %arg9: memref<128x128xf32, #tpu.memory_space<vmem>>, %arg10: memref<1x128xf32, #tpu.memory_space<vmem>>, %arg11: memref<128x128xf32, #tpu.memory_space<vmem>>, %arg12: memref<1x128xf32, #tpu.memory_space<vmem>>, %arg13: memref<1x128xf32, #tpu.memory_space<vmem>>, %arg14: memref<1x128xf32, #tpu.memory_space<vmem>>, %arg15: memref<128x256xf32, #tpu.memory_space<vmem>>, %arg16: memref<1x256xf32, #tpu.memory_space<vmem>>, %arg17: memref<256x128xf32, #tpu.memory_space<vmem>>, %arg18: memref<1x128xf32, #tpu.memory_space<vmem>>, %arg19: memref<1x8x128xf32, #tpu.memory_space<vmem>>) attributes {dimension_semantics = [#tpu.dimension_semantics<parallel>], iteration_bounds = array<i64: 2>, scalar_prefetch = 0 : i64, scratch_operands = 0 : i64, tpu.core_type = #tpu.core_type<tc>, window_params = [{transform_indices = @transform_0, window_bounds = array<i64: 1, 8, 128>}, {transform_indices = @transform_1, window_bounds = array<i64: 1, 1, 8>}, {pipeline_mode = #tpu.pipeline_mode<synchronous>, transform_indices = @transform_2, window_bounds = array<i64: 1, 128>}, {pipeline_mode = #tpu.pipeline_mode<synchronous>, transform_indices = @transform_3, window_bounds = array<i64: 1, 128>}, {pipeline_mode = #tpu.pipeline_mode<synchronous>, transform_indices = @transform_4, window_bounds = array<i64: 128, 128>}, {pipeline_mode = #tpu.pipeline_mode<synchronous>, transform_indices = @transform_5, window_bounds = array<i64: 1, 128>}, {pipeline_mode = #tpu.pipeline_mode<synchronous>, transform_indices = @transform_6, window_bounds = array<i64: 128, 128>}, {pipeline_mode = #tpu.pipeline_mode<synchronous>, transform_indices = @transform_7, window_bounds = array<i64: 1, 128>}, {pipeline_mode = #tpu.pipeline_mode<synchronous>, transform_indices = @transform_8, window_bounds = array<i64: 128, 128>}, {pipeline_mode = #tpu.pipeline_mode<synchronous>, transform_indices = @transform_9, window_bounds = array<i64: 1, 128>}, {pipeline_mode = #tpu.pipeline_mode<synchronous>, transform_indices = @transform_10, window_bounds = array<i64: 128, 128>}, {pipeline_mode = #tpu.pipeline_mode<synchronous>, transform_indices = @transform_11, window_bounds = array<i64: 1, 128>}, {pipeline_mode = #tpu.pipeline_mode<synchronous>, transform_indices = @transform_12, window_bounds = array<i64: 1, 128>}, {pipeline_mode = #tpu.pipeline_mode<synchronous>, transform_indices = @transform_13, window_bounds = array<i64: 1, 128>}, {pipeline_mode = #tpu.pipeline_mode<synchronous>, transform_indices = @transform_14, window_bounds = array<i64: 128, 256>}, {pipeline_mode = #tpu.pipeline_mode<synchronous>, transform_indices = @transform_15, window_bounds = array<i64: 1, 256>}, {pipeline_mode = #tpu.pipeline_mode<synchronous>, transform_indices = @transform_16, window_bounds = array<i64: 256, 128>}, {pipeline_mode = #tpu.pipeline_mode<synchronous>, transform_indices = @transform_17, window_bounds = array<i64: 1, 128>}, {transform_indices = @transform_18, window_bounds = array<i64: 1, 8, 128>}]} {
    %c0 = arith.constant 0 : index
    %c0_0 = arith.constant 0 : index
    %c0_1 = arith.constant 0 : index
    %0 = vector.load %arg1[%c0, %c0_0, %c0_1] : memref<1x8x128xf32, #tpu.memory_space<vmem>>, vector<1x8x128xf32>
    %1 = vector.shape_cast %0 : vector<1x8x128xf32> to vector<8x128xf32>
    %c0_2 = arith.constant 0 : index
    %c0_3 = arith.constant 0 : index
    %c0_4 = arith.constant 0 : index
    %2 = vector.load %arg2[%c0_2, %c0_3, %c0_4] : memref<1x1x8xf32, #tpu.memory_space<vmem>>, vector<1x1x8xf32>
    %3 = vector.shape_cast %2 : vector<1x1x8xf32> to vector<1x8xf32>
    %c0_5 = arith.constant 0 : index
    %c0_6 = arith.constant 0 : index
    %4 = vector.load %arg3[%c0_5, %c0_6] : memref<1x128xf32, #tpu.memory_space<vmem>>, vector<1x128xf32>
    %c0_7 = arith.constant 0 : index
    %c0_8 = arith.constant 0 : index
    %5 = vector.load %arg4[%c0_7, %c0_8] : memref<1x128xf32, #tpu.memory_space<vmem>>, vector<1x128xf32>
    %cst = arith.constant dense<0.000000e+00> : vector<8xf32>
    %6 = vector.multi_reduction <add>, %1, %cst [1] : vector<8x128xf32> to vector<8xf32>
    %7 = vector.shape_cast %6 : vector<8xf32> to vector<8x1xf32>
    %cst_9 = arith.constant 1.280000e+02 : f32
    %8 = vector.broadcast %cst_9 : f32 to vector<8x1xf32>
    %9 = arith.divf %7, %8 : vector<8x1xf32>
    %10 = vector.broadcast %9 : vector<8x1xf32> to vector<8x128xf32>
    %11 = arith.subf %1, %10 : vector<8x128xf32>
    %12 = arith.mulf %11, %11 : vector<8x128xf32>
    %cst_10 = arith.constant dense<0.000000e+00> : vector<8xf32>
    %13 = vector.multi_reduction <add>, %12, %cst_10 [1] : vector<8x128xf32> to vector<8xf32>
    %14 = vector.shape_cast %13 : vector<8xf32> to vector<8x1xf32>
    %cst_11 = arith.constant 1.270000e+02 : f32
    %15 = vector.broadcast %cst_11 : f32 to vector<8x1xf32>
    %16 = arith.divf %14, %15 : vector<8x1xf32>
    %17 = math.sqrt %16 : vector<8x1xf32>
    %18 = vector.broadcast %4 : vector<1x128xf32> to vector<8x128xf32>
    %19 = arith.mulf %18, %11 : vector<8x128xf32>
    %cst_12 = arith.constant 9.99999997E-7 : f32
    %20 = vector.broadcast %cst_12 : f32 to vector<8x1xf32>
    %21 = arith.addf %17, %20 : vector<8x1xf32>
    %22 = vector.broadcast %21 : vector<8x1xf32> to vector<8x128xf32>
    %23 = arith.divf %19, %22 : vector<8x128xf32>
    %24 = vector.broadcast %5 : vector<1x128xf32> to vector<8x128xf32>
    %25 = arith.addf %23, %24 : vector<8x128xf32>
    %c0_13 = arith.constant 0 : index
    %c0_14 = arith.constant 0 : index
    %26 = vector.load %arg5[%c0_13, %c0_14] : memref<128x128xf32, #tpu.memory_space<vmem>>, vector<128x128xf32>
    %cst_15 = arith.constant dense<0.000000e+00> : vector<8x128xf32>
    %27 = tpu.matmul %25, %26, %cst_15 {dimension_numbers = #tpu.dot_dimension_numbers<[1], [0], [0], [1], [0, 0, 1, 1], [], []>} : vector<8x128xf32>, vector<128x128xf32>, vector<8x128xf32> -> vector<8x128xf32>
    %c0_16 = arith.constant 0 : index
    %c0_17 = arith.constant 0 : index
    %28 = vector.load %arg6[%c0_16, %c0_17] : memref<1x128xf32, #tpu.memory_space<vmem>>, vector<1x128xf32>
    %29 = vector.broadcast %28 : vector<1x128xf32> to vector<8x128xf32>
    %30 = arith.addf %27, %29 : vector<8x128xf32>
    %c0_18 = arith.constant 0 : index
    %c0_19 = arith.constant 0 : index
    %31 = vector.load %arg7[%c0_18, %c0_19] : memref<128x128xf32, #tpu.memory_space<vmem>>, vector<128x128xf32>
    %cst_20 = arith.constant dense<0.000000e+00> : vector<8x128xf32>
    %32 = tpu.matmul %25, %31, %cst_20 {dimension_numbers = #tpu.dot_dimension_numbers<[1], [0], [0], [1], [0, 0, 1, 1], [], []>} : vector<8x128xf32>, vector<128x128xf32>, vector<8x128xf32> -> vector<8x128xf32>
    %c0_21 = arith.constant 0 : index
    %c0_22 = arith.constant 0 : index
    %33 = vector.load %arg8[%c0_21, %c0_22] : memref<1x128xf32, #tpu.memory_space<vmem>>, vector<1x128xf32>
    %34 = vector.broadcast %33 : vector<1x128xf32> to vector<8x128xf32>
    %35 = arith.addf %32, %34 : vector<8x128xf32>
    %c0_23 = arith.constant 0 : index
    %c0_24 = arith.constant 0 : index
    %36 = vector.load %arg9[%c0_23, %c0_24] : memref<128x128xf32, #tpu.memory_space<vmem>>, vector<128x128xf32>
    %cst_25 = arith.constant dense<0.000000e+00> : vector<8x128xf32>
    %37 = tpu.matmul %25, %36, %cst_25 {dimension_numbers = #tpu.dot_dimension_numbers<[1], [0], [0], [1], [0, 0, 1, 1], [], []>} : vector<8x128xf32>, vector<128x128xf32>, vector<8x128xf32> -> vector<8x128xf32>
    %c0_26 = arith.constant 0 : index
    %c0_27 = arith.constant 0 : index
    %38 = vector.load %arg10[%c0_26, %c0_27] : memref<1x128xf32, #tpu.memory_space<vmem>>, vector<1x128xf32>
    %39 = vector.broadcast %38 : vector<1x128xf32> to vector<8x128xf32>
    %40 = arith.addf %37, %39 : vector<8x128xf32>
    %41 = vector.extract_strided_slice %30 {offsets = [0, 0], sizes = [8, 32], strides = [1, 1]} : vector<8x128xf32> to vector<8x32xf32>
    %42 = vector.extract_strided_slice %35 {offsets = [0, 0], sizes = [8, 32], strides = [1, 1]} : vector<8x128xf32> to vector<8x32xf32>
    %43 = vector.extract_strided_slice %40 {offsets = [0, 0], sizes = [8, 32], strides = [1, 1]} : vector<8x128xf32> to vector<8x32xf32>
    %44 = tpu.transpose %42, [1, 0] : vector<8x32xf32> -> vector<32x8xf32>
    %cst_28 = arith.constant dense<0.000000e+00> : vector<8x8xf32>
    %45 = tpu.matmul %41, %44, %cst_28 {dimension_numbers = #tpu.dot_dimension_numbers<[1], [0], [0], [1], [0, 0, 1, 1], [], []>} : vector<8x32xf32>, vector<32x8xf32>, vector<8x8xf32> -> vector<8x8xf32>
    %cst_29 = arith.constant 0.176776692 : f32
    %46 = vector.broadcast %cst_29 : f32 to vector<8x8xf32>
    %47 = arith.mulf %45, %46 : vector<8x8xf32>
    %cst_30 = arith.constant 0.000000e+00 : f32
    %48 = vector.broadcast %cst_30 : f32 to vector<1x8xf32>
    %49 = arith.cmpf ogt, %3, %48 : vector<1x8xf32>
    %cst_31 = arith.constant -1.000000e+09 : f32
    %50 = vector.shape_cast %49 : vector<1x8xi1> to vector<1x8xi1>
    %51 = vector.broadcast %50 : vector<1x8xi1> to vector<8x8xi1>
    %52 = vector.broadcast %cst_31 : f32 to vector<8x8xf32>
    %53 = arith.select %51, %47, %52 : vector<8x8xi1>, vector<8x8xf32>
    %cst_32 = arith.constant dense<0xFF800000> : vector<8xf32>
    %54 = vector.multi_reduction <maximumf>, %53, %cst_32 [1] : vector<8x8xf32> to vector<8xf32>
    %55 = vector.shape_cast %54 : vector<8xf32> to vector<8x1xf32>
    %56 = vector.broadcast %55 : vector<8x1xf32> to vector<8x8xf32>
    %57 = arith.subf %53, %56 : vector<8x8xf32>
    %58 = math.exp %57 : vector<8x8xf32>
    %cst_33 = arith.constant dense<0.000000e+00> : vector<8xf32>
    %59 = vector.multi_reduction <add>, %58, %cst_33 [1] : vector<8x8xf32> to vector<8xf32>
    %60 = vector.shape_cast %59 : vector<8xf32> to vector<8x1xf32>
    %61 = vector.broadcast %60 : vector<8x1xf32> to vector<8x8xf32>
    %62 = arith.divf %58, %61 : vector<8x8xf32>
    %cst_34 = arith.constant dense<0.000000e+00> : vector<8x32xf32>
    %63 = tpu.matmul %62, %43, %cst_34 {dimension_numbers = #tpu.dot_dimension_numbers<[1], [0], [0], [1], [0, 0, 1, 1], [], []>} : vector<8x8xf32>, vector<8x32xf32>, vector<8x32xf32> -> vector<8x32xf32>
    %64 = vector.extract_strided_slice %30 {offsets = [0, 32], sizes = [8, 32], strides = [1, 1]} : vector<8x128xf32> to vector<8x32xf32>
    %65 = vector.extract_strided_slice %35 {offsets = [0, 32], sizes = [8, 32], strides = [1, 1]} : vector<8x128xf32> to vector<8x32xf32>
    %66 = vector.extract_strided_slice %40 {offsets = [0, 32], sizes = [8, 32], strides = [1, 1]} : vector<8x128xf32> to vector<8x32xf32>
    %67 = tpu.transpose %65, [1, 0] : vector<8x32xf32> -> vector<32x8xf32>
    %cst_35 = arith.constant dense<0.000000e+00> : vector<8x8xf32>
    %68 = tpu.matmul %64, %67, %cst_35 {dimension_numbers = #tpu.dot_dimension_numbers<[1], [0], [0], [1], [0, 0, 1, 1], [], []>} : vector<8x32xf32>, vector<32x8xf32>, vector<8x8xf32> -> vector<8x8xf32>
    %cst_36 = arith.constant 0.176776692 : f32
    %69 = vector.broadcast %cst_36 : f32 to vector<8x8xf32>
    %70 = arith.mulf %68, %69 : vector<8x8xf32>
    %cst_37 = arith.constant 0.000000e+00 : f32
    %71 = vector.broadcast %cst_37 : f32 to vector<1x8xf32>
    %72 = arith.cmpf ogt, %3, %71 : vector<1x8xf32>
    %cst_38 = arith.constant -1.000000e+09 : f32
    %73 = vector.shape_cast %72 : vector<1x8xi1> to vector<1x8xi1>
    %74 = vector.broadcast %73 : vector<1x8xi1> to vector<8x8xi1>
    %75 = vector.broadcast %cst_38 : f32 to vector<8x8xf32>
    %76 = arith.select %74, %70, %75 : vector<8x8xi1>, vector<8x8xf32>
    %cst_39 = arith.constant dense<0xFF800000> : vector<8xf32>
    %77 = vector.multi_reduction <maximumf>, %76, %cst_39 [1] : vector<8x8xf32> to vector<8xf32>
    %78 = vector.shape_cast %77 : vector<8xf32> to vector<8x1xf32>
    %79 = vector.broadcast %78 : vector<8x1xf32> to vector<8x8xf32>
    %80 = arith.subf %76, %79 : vector<8x8xf32>
    %81 = math.exp %80 : vector<8x8xf32>
    %cst_40 = arith.constant dense<0.000000e+00> : vector<8xf32>
    %82 = vector.multi_reduction <add>, %81, %cst_40 [1] : vector<8x8xf32> to vector<8xf32>
    %83 = vector.shape_cast %82 : vector<8xf32> to vector<8x1xf32>
    %84 = vector.broadcast %83 : vector<8x1xf32> to vector<8x8xf32>
    %85 = arith.divf %81, %84 : vector<8x8xf32>
    %cst_41 = arith.constant dense<0.000000e+00> : vector<8x32xf32>
    %86 = tpu.matmul %85, %66, %cst_41 {dimension_numbers = #tpu.dot_dimension_numbers<[1], [0], [0], [1], [0, 0, 1, 1], [], []>} : vector<8x8xf32>, vector<8x32xf32>, vector<8x32xf32> -> vector<8x32xf32>
    %87 = vector.extract_strided_slice %30 {offsets = [0, 64], sizes = [8, 32], strides = [1, 1]} : vector<8x128xf32> to vector<8x32xf32>
    %88 = vector.extract_strided_slice %35 {offsets = [0, 64], sizes = [8, 32], strides = [1, 1]} : vector<8x128xf32> to vector<8x32xf32>
    %89 = vector.extract_strided_slice %40 {offsets = [0, 64], sizes = [8, 32], strides = [1, 1]} : vector<8x128xf32> to vector<8x32xf32>
    %90 = tpu.transpose %88, [1, 0] : vector<8x32xf32> -> vector<32x8xf32>
    %cst_42 = arith.constant dense<0.000000e+00> : vector<8x8xf32>
    %91 = tpu.matmul %87, %90, %cst_42 {dimension_numbers = #tpu.dot_dimension_numbers<[1], [0], [0], [1], [0, 0, 1, 1], [], []>} : vector<8x32xf32>, vector<32x8xf32>, vector<8x8xf32> -> vector<8x8xf32>
    %cst_43 = arith.constant 0.176776692 : f32
    %92 = vector.broadcast %cst_43 : f32 to vector<8x8xf32>
    %93 = arith.mulf %91, %92 : vector<8x8xf32>
    %cst_44 = arith.constant 0.000000e+00 : f32
    %94 = vector.broadcast %cst_44 : f32 to vector<1x8xf32>
    %95 = arith.cmpf ogt, %3, %94 : vector<1x8xf32>
    %cst_45 = arith.constant -1.000000e+09 : f32
    %96 = vector.shape_cast %95 : vector<1x8xi1> to vector<1x8xi1>
    %97 = vector.broadcast %96 : vector<1x8xi1> to vector<8x8xi1>
    %98 = vector.broadcast %cst_45 : f32 to vector<8x8xf32>
    %99 = arith.select %97, %93, %98 : vector<8x8xi1>, vector<8x8xf32>
    %cst_46 = arith.constant dense<0xFF800000> : vector<8xf32>
    %100 = vector.multi_reduction <maximumf>, %99, %cst_46 [1] : vector<8x8xf32> to vector<8xf32>
    %101 = vector.shape_cast %100 : vector<8xf32> to vector<8x1xf32>
    %102 = vector.broadcast %101 : vector<8x1xf32> to vector<8x8xf32>
    %103 = arith.subf %99, %102 : vector<8x8xf32>
    %104 = math.exp %103 : vector<8x8xf32>
    %cst_47 = arith.constant dense<0.000000e+00> : vector<8xf32>
    %105 = vector.multi_reduction <add>, %104, %cst_47 [1] : vector<8x8xf32> to vector<8xf32>
    %106 = vector.shape_cast %105 : vector<8xf32> to vector<8x1xf32>
    %107 = vector.broadcast %106 : vector<8x1xf32> to vector<8x8xf32>
    %108 = arith.divf %104, %107 : vector<8x8xf32>
    %cst_48 = arith.constant dense<0.000000e+00> : vector<8x32xf32>
    %109 = tpu.matmul %108, %89, %cst_48 {dimension_numbers = #tpu.dot_dimension_numbers<[1], [0], [0], [1], [0, 0, 1, 1], [], []>} : vector<8x8xf32>, vector<8x32xf32>, vector<8x32xf32> -> vector<8x32xf32>
    %110 = vector.extract_strided_slice %30 {offsets = [0, 96], sizes = [8, 32], strides = [1, 1]} : vector<8x128xf32> to vector<8x32xf32>
    %111 = vector.extract_strided_slice %35 {offsets = [0, 96], sizes = [8, 32], strides = [1, 1]} : vector<8x128xf32> to vector<8x32xf32>
    %112 = vector.extract_strided_slice %40 {offsets = [0, 96], sizes = [8, 32], strides = [1, 1]} : vector<8x128xf32> to vector<8x32xf32>
    %113 = tpu.transpose %111, [1, 0] : vector<8x32xf32> -> vector<32x8xf32>
    %cst_49 = arith.constant dense<0.000000e+00> : vector<8x8xf32>
    %114 = tpu.matmul %110, %113, %cst_49 {dimension_numbers = #tpu.dot_dimension_numbers<[1], [0], [0], [1], [0, 0, 1, 1], [], []>} : vector<8x32xf32>, vector<32x8xf32>, vector<8x8xf32> -> vector<8x8xf32>
    %cst_50 = arith.constant 0.176776692 : f32
    %115 = vector.broadcast %cst_50 : f32 to vector<8x8xf32>
    %116 = arith.mulf %114, %115 : vector<8x8xf32>
    %cst_51 = arith.constant 0.000000e+00 : f32
    %117 = vector.broadcast %cst_51 : f32 to vector<1x8xf32>
    %118 = arith.cmpf ogt, %3, %117 : vector<1x8xf32>
    %cst_52 = arith.constant -1.000000e+09 : f32
    %119 = vector.shape_cast %118 : vector<1x8xi1> to vector<1x8xi1>
    %120 = vector.broadcast %119 : vector<1x8xi1> to vector<8x8xi1>
    %121 = vector.broadcast %cst_52 : f32 to vector<8x8xf32>
    %122 = arith.select %120, %116, %121 : vector<8x8xi1>, vector<8x8xf32>
    %cst_53 = arith.constant dense<0xFF800000> : vector<8xf32>
    %123 = vector.multi_reduction <maximumf>, %122, %cst_53 [1] : vector<8x8xf32> to vector<8xf32>
    %124 = vector.shape_cast %123 : vector<8xf32> to vector<8x1xf32>
    %125 = vector.broadcast %124 : vector<8x1xf32> to vector<8x8xf32>
    %126 = arith.subf %122, %125 : vector<8x8xf32>
    %127 = math.exp %126 : vector<8x8xf32>
    %cst_54 = arith.constant dense<0.000000e+00> : vector<8xf32>
    %128 = vector.multi_reduction <add>, %127, %cst_54 [1] : vector<8x8xf32> to vector<8xf32>
    %129 = vector.shape_cast %128 : vector<8xf32> to vector<8x1xf32>
    %130 = vector.broadcast %129 : vector<8x1xf32> to vector<8x8xf32>
    %131 = arith.divf %127, %130 : vector<8x8xf32>
    %cst_55 = arith.constant dense<0.000000e+00> : vector<8x32xf32>
    %132 = tpu.matmul %131, %112, %cst_55 {dimension_numbers = #tpu.dot_dimension_numbers<[1], [0], [0], [1], [0, 0, 1, 1], [], []>} : vector<8x8xf32>, vector<8x32xf32>, vector<8x32xf32> -> vector<8x32xf32>
    %133 = tpu.concatenate %63, %86, %109, %132 in 1 : vector<8x32xf32>, vector<8x32xf32>, vector<8x32xf32>, vector<8x32xf32> -> vector<8x128xf32>
    %c0_56 = arith.constant 0 : index
    %c0_57 = arith.constant 0 : index
    %134 = vector.load %arg11[%c0_56, %c0_57] : memref<128x128xf32, #tpu.memory_space<vmem>>, vector<128x128xf32>
    %cst_58 = arith.constant dense<0.000000e+00> : vector<8x128xf32>
    %135 = tpu.matmul %133, %134, %cst_58 {dimension_numbers = #tpu.dot_dimension_numbers<[1], [0], [0], [1], [0, 0, 1, 1], [], []>} : vector<8x128xf32>, vector<128x128xf32>, vector<8x128xf32> -> vector<8x128xf32>
    %c0_59 = arith.constant 0 : index
    %c0_60 = arith.constant 0 : index
    %136 = vector.load %arg12[%c0_59, %c0_60] : memref<1x128xf32, #tpu.memory_space<vmem>>, vector<1x128xf32>
    %137 = vector.broadcast %136 : vector<1x128xf32> to vector<8x128xf32>
    %138 = arith.addf %135, %137 : vector<8x128xf32>
    %139 = arith.addf %1, %138 : vector<8x128xf32>
    %c0_61 = arith.constant 0 : index
    %c0_62 = arith.constant 0 : index
    %140 = vector.load %arg13[%c0_61, %c0_62] : memref<1x128xf32, #tpu.memory_space<vmem>>, vector<1x128xf32>
    %c0_63 = arith.constant 0 : index
    %c0_64 = arith.constant 0 : index
    %141 = vector.load %arg14[%c0_63, %c0_64] : memref<1x128xf32, #tpu.memory_space<vmem>>, vector<1x128xf32>
    %cst_65 = arith.constant dense<0.000000e+00> : vector<8xf32>
    %142 = vector.multi_reduction <add>, %139, %cst_65 [1] : vector<8x128xf32> to vector<8xf32>
    %143 = vector.shape_cast %142 : vector<8xf32> to vector<8x1xf32>
    %cst_66 = arith.constant 1.280000e+02 : f32
    %144 = vector.broadcast %cst_66 : f32 to vector<8x1xf32>
    %145 = arith.divf %143, %144 : vector<8x1xf32>
    %146 = vector.broadcast %145 : vector<8x1xf32> to vector<8x128xf32>
    %147 = arith.subf %139, %146 : vector<8x128xf32>
    %148 = arith.mulf %147, %147 : vector<8x128xf32>
    %cst_67 = arith.constant dense<0.000000e+00> : vector<8xf32>
    %149 = vector.multi_reduction <add>, %148, %cst_67 [1] : vector<8x128xf32> to vector<8xf32>
    %150 = vector.shape_cast %149 : vector<8xf32> to vector<8x1xf32>
    %cst_68 = arith.constant 1.270000e+02 : f32
    %151 = vector.broadcast %cst_68 : f32 to vector<8x1xf32>
    %152 = arith.divf %150, %151 : vector<8x1xf32>
    %153 = math.sqrt %152 : vector<8x1xf32>
    %154 = vector.broadcast %140 : vector<1x128xf32> to vector<8x128xf32>
    %155 = arith.mulf %154, %147 : vector<8x128xf32>
    %cst_69 = arith.constant 9.99999997E-7 : f32
    %156 = vector.broadcast %cst_69 : f32 to vector<8x1xf32>
    %157 = arith.addf %153, %156 : vector<8x1xf32>
    %158 = vector.broadcast %157 : vector<8x1xf32> to vector<8x128xf32>
    %159 = arith.divf %155, %158 : vector<8x128xf32>
    %160 = vector.broadcast %141 : vector<1x128xf32> to vector<8x128xf32>
    %161 = arith.addf %159, %160 : vector<8x128xf32>
    %c0_70 = arith.constant 0 : index
    %c0_71 = arith.constant 0 : index
    %162 = vector.load %arg15[%c0_70, %c0_71] : memref<128x256xf32, #tpu.memory_space<vmem>>, vector<128x256xf32>
    %cst_72 = arith.constant dense<0.000000e+00> : vector<8x256xf32>
    %163 = tpu.matmul %161, %162, %cst_72 {dimension_numbers = #tpu.dot_dimension_numbers<[1], [0], [0], [1], [0, 0, 1, 1], [], []>} : vector<8x128xf32>, vector<128x256xf32>, vector<8x256xf32> -> vector<8x256xf32>
    %c0_73 = arith.constant 0 : index
    %c0_74 = arith.constant 0 : index
    %164 = vector.load %arg16[%c0_73, %c0_74] : memref<1x256xf32, #tpu.memory_space<vmem>>, vector<1x256xf32>
    %165 = vector.broadcast %164 : vector<1x256xf32> to vector<8x256xf32>
    %166 = arith.addf %163, %165 : vector<8x256xf32>
    %cst_75 = arith.constant 0.000000e+00 : f32
    %167 = vector.broadcast %cst_75 : f32 to vector<8x256xf32>
    %168 = arith.maximumf %166, %167 : vector<8x256xf32>
    %c0_76 = arith.constant 0 : index
    %c0_77 = arith.constant 0 : index
    %169 = vector.load %arg17[%c0_76, %c0_77] : memref<256x128xf32, #tpu.memory_space<vmem>>, vector<256x128xf32>
    %cst_78 = arith.constant dense<0.000000e+00> : vector<8x128xf32>
    %170 = tpu.matmul %168, %169, %cst_78 {dimension_numbers = #tpu.dot_dimension_numbers<[1], [0], [0], [1], [0, 0, 1, 1], [], []>} : vector<8x256xf32>, vector<256x128xf32>, vector<8x128xf32> -> vector<8x128xf32>
    %c0_79 = arith.constant 0 : index
    %c0_80 = arith.constant 0 : index
    %171 = vector.load %arg18[%c0_79, %c0_80] : memref<1x128xf32, #tpu.memory_space<vmem>>, vector<1x128xf32>
    %172 = vector.broadcast %171 : vector<1x128xf32> to vector<8x128xf32>
    %173 = arith.addf %170, %172 : vector<8x128xf32>
    %174 = arith.addf %139, %173 : vector<8x128xf32>
    %c0_81 = arith.constant 0 : index
    %c0_82 = arith.constant 0 : index
    %c0_83 = arith.constant 0 : index
    %175 = vector.load %arg19[%c0_81, %c0_82, %c0_83] : memref<1x8x128xf32, #tpu.memory_space<vmem>>, vector<1x8x128xf32>
    %176 = vector.shape_cast %175 : vector<1x8x128xf32> to vector<8x128xf32>
    %177 = vector.shape_cast %174 : vector<8x128xf32> to vector<1x8x128xf32>
    tpu.vector_store %arg19[%c0_81, %c0_82, %c0_83], %177 {strides = array<i32>} : memref<1x8x128xf32, #tpu.memory_space<vmem>>, vector<1x8x128xf32>,
    return
  }
  func.func @transform_0(%arg0: i32) -> (i32, i32, i32) {
    %c0_i32 = arith.constant 0 : i32
    %c0_i32_0 = arith.constant 0 : i32
    %c0_i32_1 = arith.constant 0 : i32
    return %arg0, %c0_i32, %c0_i32_0 : i32, i32, i32
  }
  func.func @transform_1(%arg0: i32) -> (i32, i32, i32) {
    %c0_i32 = arith.constant 0 : i32
    %c0_i32_0 = arith.constant 0 : i32
    %c0_i32_1 = arith.constant 0 : i32
    return %arg0, %c0_i32, %c0_i32_0 : i32, i32, i32
  }
  func.func @transform_2(%arg0: i32) -> (i32, i32) {
    %c0_i32 = arith.constant 0 : i32
    %c0_i32_0 = arith.constant 0 : i32
    %c0_i32_1 = arith.constant 0 : i32
    return %c0_i32, %c0_i32_0 : i32, i32
  }
  func.func @transform_3(%arg0: i32) -> (i32, i32) {
    %c0_i32 = arith.constant 0 : i32
    %c0_i32_0 = arith.constant 0 : i32
    %c0_i32_1 = arith.constant 0 : i32
    return %c0_i32, %c0_i32_0 : i32, i32
  }
  func.func @transform_4(%arg0: i32) -> (i32, i32) {
    %c0_i32 = arith.constant 0 : i32
    %c0_i32_0 = arith.constant 0 : i32
    %c0_i32_1 = arith.constant 0 : i32
    return %c0_i32, %c0_i32_0 : i32, i32
  }
  func.func @transform_5(%arg0: i32) -> (i32, i32) {
    %c0_i32 = arith.constant 0 : i32
    %c0_i32_0 = arith.constant 0 : i32
    %c0_i32_1 = arith.constant 0 : i32
    return %c0_i32, %c0_i32_0 : i32, i32
  }
  func.func @transform_6(%arg0: i32) -> (i32, i32) {
    %c0_i32 = arith.constant 0 : i32
    %c0_i32_0 = arith.constant 0 : i32
    %c0_i32_1 = arith.constant 0 : i32
    return %c0_i32, %c0_i32_0 : i32, i32
  }
  func.func @transform_7(%arg0: i32) -> (i32, i32) {
    %c0_i32 = arith.constant 0 : i32
    %c0_i32_0 = arith.constant 0 : i32
    %c0_i32_1 = arith.constant 0 : i32
    return %c0_i32, %c0_i32_0 : i32, i32
  }
  func.func @transform_8(%arg0: i32) -> (i32, i32) {
    %c0_i32 = arith.constant 0 : i32
    %c0_i32_0 = arith.constant 0 : i32
    %c0_i32_1 = arith.constant 0 : i32
    return %c0_i32, %c0_i32_0 : i32, i32
  }
  func.func @transform_9(%arg0: i32) -> (i32, i32) {
    %c0_i32 = arith.constant 0 : i32
    %c0_i32_0 = arith.constant 0 : i32
    %c0_i32_1 = arith.constant 0 : i32
    return %c0_i32, %c0_i32_0 : i32, i32
  }
  func.func @transform_10(%arg0: i32) -> (i32, i32) {
    %c0_i32 = arith.constant 0 : i32
    %c0_i32_0 = arith.constant 0 : i32
    %c0_i32_1 = arith.constant 0 : i32
    return %c0_i32, %c0_i32_0 : i32, i32
  }
  func.func @transform_11(%arg0: i32) -> (i32, i32) {
    %c0_i32 = arith.constant 0 : i32
    %c0_i32_0 = arith.constant 0 : i32
    %c0_i32_1 = arith.constant 0 : i32
    return %c0_i32, %c0_i32_0 : i32, i32
  }
  func.func @transform_12(%arg0: i32) -> (i32, i32) {
    %c0_i32 = arith.constant 0 : i32
    %c0_i32_0 = arith.constant 0 : i32
    %c0_i32_1 = arith.constant 0 : i32
    return %c0_i32, %c0_i32_0 : i32, i32
  }
  func.func @transform_13(%arg0: i32) -> (i32, i32) {
    %c0_i32 = arith.constant 0 : i32
    %c0_i32_0 = arith.constant 0 : i32
    %c0_i32_1 = arith.constant 0 : i32
    return %c0_i32, %c0_i32_0 : i32, i32
  }
  func.func @transform_14(%arg0: i32) -> (i32, i32) {
    %c0_i32 = arith.constant 0 : i32
    %c0_i32_0 = arith.constant 0 : i32
    %c0_i32_1 = arith.constant 0 : i32
    return %c0_i32, %c0_i32_0 : i32, i32
  }
  func.func @transform_15(%arg0: i32) -> (i32, i32) {
    %c0_i32 = arith.constant 0 : i32
    %c0_i32_0 = arith.constant 0 : i32
    %c0_i32_1 = arith.constant 0 : i32
    return %c0_i32, %c0_i32_0 : i32, i32
  }
  func.func @transform_16(%arg0: i32) -> (i32, i32) {
    %c0_i32 = arith.constant 0 : i32
    %c0_i32_0 = arith.constant 0 : i32
    %c0_i32_1 = arith.constant 0 : i32
    return %c0_i32, %c0_i32_0 : i32, i32
  }
  func.func @transform_17(%arg0: i32) -> (i32, i32) {
    %c0_i32 = arith.constant 0 : i32
    %c0_i32_0 = arith.constant 0 : i32
    %c0_i32_1 = arith.constant 0 : i32
    return %c0_i32, %c0_i32_0 : i32, i32
  }
  func.func @transform_18(%arg0: i32) -> (i32, i32, i32) {
    %c0_i32 = arith.constant 0 : i32
    %c0_i32_0 = arith.constant 0 : i32
    %c0_i32_1 = arith.constant 0 : i32
    return %arg0, %c0_i32, %c0_i32_0 : i32, i32, i32
  }
}

</mosaic_0001>

<bundles_post_ra>
// kernel: tpu_custom_call.1
= control target key start
LH: loop header
LB: loop body
LE: loop exit
PB: predicated region body
PF: predicated region fallthrough
CT: control target
= control target key end

     0   :  { %s3775_s0 = inlined_call_operand.hbm [shape: f32[2,8,128], index: 0, kind: input, shape index: {}]   ;;  %s3776_s1 = inlined_call_operand.vmem [shape: f32[2,1,8], index: 1, kind: input, shape index: {}]   ;;  %s3777_s2 = inlined_call_operand.vmem [shape: f32[1,128], index: 2, kind: input, shape index: {}]   ;;  %s3778_s3 = inlined_call_operand.vmem [shape: f32[1,128], index: 3, kind: input, shape index: {}]   ;;  %s3779_s4 = inlined_call_operand.hbm [shape: f32[128,128], index: 4, kind: input, shape index: {}]   ;;  %s3780_s5 = inlined_call_operand.vmem [shape: f32[1,128], index: 5, kind: input, shape index: {}]   ;;  %s3781_s6 = inlined_call_operand.hbm [shape: f32[128,128], index: 6, kind: input, shape index: {}]   ;;  %s3782_s7 = inlined_call_operand.vmem [shape: f32[1,128], index: 7, kind: input, shape index: {}]   ;;  %s3783_s8 = inlined_call_operand.hbm [shape: f32[128,128], index: 8, kind: input, shape index: {}]   ;;  %s3784_s9 = inlined_call_operand.vmem [shape: f32[1,128], index: 9, kind: input, shape index: {}]   ;;  %s3785_s10 = inlined_call_operand.hbm [shape: f32[128,128], index: 10, kind: input, shape index: {}]   ;;  %s3786_s11 = inlined_call_operand.vmem [shape: f32[1,128], index: 11, kind: input, shape index: {}]   ;;  %s3787_s12 = inlined_call_operand.vmem [shape: f32[1,128], index: 12, kind: input, shape index: {}]   ;;  %s3788_s13 = inlined_call_operand.vmem [shape: f32[1,128], index: 13, kind: input, shape index: {}]   ;;  %s3789_s14 = inlined_call_operand.hbm [shape: f32[128,256], index: 14, kind: input, shape index: {}]   ;;  %s3790_s15 = inlined_call_operand.vmem [shape: f32[1,256], index: 15, kind: input, shape index: {}]   ;;  %s3791_s16 = inlined_call_operand.hbm [shape: f32[256,128], index: 16, kind: input, shape index: {}]   ;;  %s3792_s17 = inlined_call_operand.vmem [shape: f32[1,128], index: 17, kind: input, shape index: {}]   ;;  %s3793_s18 = inlined_call_operand.hbm [shape: f32[2,8,128], index: 18, kind: output, shape index: {}]  }
   0x1   :  { %3803 = sst [smem:[#allocation20_spill]] %s3775_s0 }
   0x2   :  { %3804 = sst [smem:[#allocation21_spill]] %s3776_s1 }
   0x3   :  { %3805 = sst [smem:[#allocation22_spill]] %s3777_s2 }
   0x4   :  { %3806 = sst [smem:[#allocation23_spill]] %s3779_s4 }
   0x5   :  { %3807 = sst [smem:[#allocation24_spill]] %s3783_s8 }
   0x6   :  { %3808 = sst [smem:[#allocation25_spill]] %s3784_s9 }
   0x7   :  { %3809 = sst [smem:[#allocation26_spill]] %s3786_s11 }
   0x8   :  { %3810 = sst [smem:[#allocation27_spill]] %s3787_s12 }
   0x9   :  { %3811 = sst [smem:[#allocation28_spill]] %s3788_s13 }
   0xa   :  { %3812 = sst [smem:[#allocation29_spill]] %s3790_s15 }
   0xb   :  { %3813 = sst [smem:[#allocation30_spill]] %s3792_s17 }
   0xc   :  { %3814 = sst [smem:[#allocation31_spill]] %s3793_s18 }
   0xd   :  { %23 = vsyncpa [#allocation3], 0 }
   0xe   :  { %25 = vsyncpa [#allocation3 + $0x1], 0 }
   0xf   :  { %26 = vsyncpa [#allocation6], 0 }
  0x10   :  { %27 = vsyncpa [#allocation9], 0 }
  0x11   :  { %28 = vsyncpa [#allocation12], 0 }
  0x12   :  { %29 = vsyncpa [#allocation4], 0 }
  0x13   :  { %31 = vsyncpa [#allocation4 + $0x1], 0  ;;  %s3243_s27 = smov 0   ;;  %s3245_s28 = smov 0  }
  0x14   :  { %s3247_s29 = smov 0   ;;  %s3249_s30 = smov 0  }
  0x15 LB: > { %s3129_s0 = smov [#allocation5]   ;;  %s3264_s1 = sadd.s32 4294967295, %s3127_s30   ;;  %s3127_s30 = sphi %s3249_s30, %s3851_s30   ;;  %s3123_s29 = sphi %s3247_s29, %s3850_s29   ;;  %s3119_s28 = sphi %s3245_s28, %s3849_s28   ;;  %s3115_s27 = sphi %s3243_s27, %s3848_s27  }
  0x16   : > { %s474_s19 = sshll.u32 %s3129_s0, 4  ;;  %p2206_p0 = scmp.ge.s32.totalorder %s3127_s30, 1  ;;  %s3269_s19 = int_to_ptr.vmem [resolvable:$true] %s474_s19 }
  0x17   : > { %p3800_p1 = scmp.eq.s32.totalorder %s3264_s1, 0  ;;  %p456_p2 = scmp.lt.s32.totalorder %s3127_s30, 3 }
  0x18   : > { %s3130_s21 = smov [#allocation8]   ;;  %s3131_s23 = smov [#allocation11]  }
  0x19   : > { %p3271_p3 = pnand %p2206_p0, %p456_p2  ;;  %s506_s22 = sshll.u32 %s3130_s21, 4  ;;  %s3284_s22 = int_to_ptr.vmem [resolvable:$true] %s506_s22 }
  0x1a   : > { %s544_s24 = sshll.u32 %s3131_s23, 4  ;;  %s3817_s4 = sld [smem:[#allocation23_spill]]  ;;  %s3286_s24 = int_to_ptr.vmem [resolvable:$true] %s544_s24 }
  0x1b   : > { %s3815_s20 = scalar_select %p3271_p3, 1, 0 }
  0x1c   : > { %p2737_p5 = pneg %p3271_p3 }
  0x1e   : > { %p3280_p6 = pnand %p2737_p5, %p3800_p1 }
  0x20   : > { %s2851_s0 = scalar_lea.hbm %s3817_s4, 2048  ;;  %p3296_p8 = pneg %p3280_p6 }
  0x21   : > { %p2852_p7 = scmp.ne.s32.totalorder %s3817_s4, %s2851_s0  ;;  %p2858_p11 = scmp.lt.u32.totalorder %s2851_s0, %s3817_s4 }
  0x23   : > { %p2854_p9 = pnand %p3296_p8, %p2852_p7 }
  0x25   : > { %p2855_p10 = pneg %p2854_p9 }
  0x27   : > { %p2860_p12 = pnand %p2858_p11, %p2855_p10 }
  0x29   : > { %2863 = shalt.err (!%p2860_p12)
}
  0x2a   : > { %s2864_s17 = scalar_lea.vmem %s3269_s19, 2048  ;;  %p2872_p5 = scmp.lt.s32.totalorder %s3269_s19, %s3269_s19 }
  0x2b   : > { %p2865_p13 = scmp.ne.s32.totalorder %s3269_s19, %s2864_s17  ;;  %p2873_p4 = scmp.lt.s32.totalorder %s2864_s17, %s2864_s17 }
  0x2d   : > { %p2867_p0 = pnand %p2865_p13, %p3296_p8  ;;  %p2874_p7 = por %p2873_p4, %p2872_p5 }
  0x2f   : > { %p2868_p2 = pneg %p2867_p0 }
  0x31   : > { %p2875_p9 = pnand %p2874_p7, %p2868_p2 }
  0x33   : > { %2878 = shalt.err (!%p2875_p9)
}
  0x34   : > { %s3796_s18 = smov 128   ;;  %s3798_s15 = smov 8  }
  0x35   : > { %2740 = dma.hbm_to_vmem [thread:$0]  (!%p3280_p6), %s3817_s4, 2048, %s3269_s19, [#allocation6], %s3796_s18, %s3796_s18, %s3798_s15  }
  0x36   : > { %s3819_s8 = sld [smem:[#allocation24_spill]] }
  0x3c   : > { %s2879_s17 = scalar_lea.hbm %s3819_s8, 2048 }
  0x3d   : > { %p2880_p4 = scmp.ne.s32.totalorder %s3819_s8, %s2879_s17  ;;  %p2886_p12 = scmp.lt.u32.totalorder %s2879_s17, %s3819_s8 }
  0x3f   : > { %p2882_p10 = pnand %p2880_p4, %p3296_p8 }
  0x41   : > { %p2883_p11 = pneg %p2882_p10 }
  0x43   : > { %p2888_p13 = pnand %p2886_p12, %p2883_p11 }
  0x45   : > { %2891 = shalt.err (!%p2888_p13)
}
  0x46   : > { %s2892_s19 = scalar_lea.vmem %s3284_s22, 2048  ;;  %p2900_p7 = scmp.lt.s32.totalorder %s3284_s22, %s3284_s22 }
  0x47   : > { %p2893_p0 = scmp.ne.s32.totalorder %s3284_s22, %s2892_s19  ;;  %p2901_p9 = scmp.lt.s32.totalorder %s2892_s19, %s2892_s19 }
  0x49   : > { %p2895_p2 = pnand %p2893_p0, %p3296_p8  ;;  %p2902_p4 = por %p2901_p9, %p2900_p7 }
  0x4b   : > { %p2896_p5 = pneg %p2895_p2 }
  0x4d   : > { %p2903_p10 = pnand %p2902_p4, %p2896_p5 }
  0x4f   : > { %2906 = shalt.err (!%p2903_p10)
}
  0x50   : > { %2746 = dma.hbm_to_vmem [thread:$0]  (!%p3280_p6), %s3819_s8, 2048, %s3284_s22, [#allocation9], %s3796_s18, %s3796_s18, %s3798_s15  }
  0x51   : > { %s2907_s25 = scalar_lea.hbm %s3789_s14, 4096 }
  0x52   : > { %p2908_p11 = scmp.ne.s32.totalorder %s3789_s14, %s2907_s25  ;;  %p2914_p0 = scmp.lt.u32.totalorder %s2907_s25, %s3789_s14 }
  0x54   : > { %p2910_p12 = pnand %p2908_p11, %p3296_p8 }
  0x56   : > { %p2911_p13 = pneg %p2910_p12 }
  0x58   : > { %p2916_p2 = pnand %p2914_p0, %p2911_p13 }
  0x5a   : > { %2919 = shalt.err (!%p2916_p2)
}
  0x5b   : > { %s2920_s22 = scalar_lea.vmem %s3286_s24, 4096  ;;  %p2928_p4 = scmp.lt.s32.totalorder %s3286_s24, %s3286_s24 }
  0x5c   : > { %p2921_p5 = scmp.ne.s32.totalorder %s3286_s24, %s2920_s22  ;;  %p2929_p10 = scmp.lt.s32.totalorder %s2920_s22, %s2920_s22 }
  0x5e   : > { %p2923_p7 = pnand %p2921_p5, %p3296_p8  ;;  %p2930_p11 = por %p2929_p10, %p2928_p4 }
  0x60   : > { %p2924_p9 = pneg %p2923_p7 }
  0x62   : > { %p2931_p12 = pnand %p2930_p11, %p2924_p9 }
  0x64   : > { %2934 = shalt.err (!%p2931_p12)
}
  0x65   : > { %s3134_s19 = smov 256   ;;  %s3135_s9 = smov 16  }
  0x66   : > { %2752 = dma.hbm_to_vmem [thread:$0]  (!%p3280_p6), %s3789_s14, 4096, %s3286_s24, [#allocation12], %s3134_s19, %s3134_s19, %s3135_s9  }
  0x67   : > { %s3136_s13 = smov [#allocation7]   ;;  %s3137_s26 = smov [#allocation10]  }
  0x68   : > { %s490_s25 = sshll.u32 %s3136_s13, 4  ;;  %s522_s0 = sshll.u32 %s3137_s26, 4  ;;  %s491_s25 = int_to_ptr.vmem [resolvable:$true] %s490_s25  ;;  %s523_s0 = int_to_ptr.vmem [resolvable:$true] %s522_s0 }
  0x69   : > { %s2935_s22 = scalar_lea.hbm %s3781_s6, 2048 }
  0x6a   : > { %p2936_p13 = scmp.ne.s32.totalorder %s3781_s6, %s2935_s22  ;;  %p2942_p5 = scmp.lt.u32.totalorder %s2935_s22, %s3781_s6 }
  0x6c   : > { %p2938_p0 = pnand %p2936_p13, %p3296_p8 }
  0x6e   : > { %p2939_p2 = pneg %p2938_p0 }
  0x70   : > { %p2944_p7 = pnand %p2942_p5, %p2939_p2 }
  0x72   : > { %2947 = shalt.err (!%p2944_p7)
}
  0x73   : > { %s2948_s24 = scalar_lea.vmem %s491_s25, 2048  ;;  %p2956_p11 = scmp.lt.s32.totalorder %s491_s25, %s491_s25 }
  0x74   : > { %p2949_p9 = scmp.ne.s32.totalorder %s491_s25, %s2948_s24  ;;  %p2957_p12 = scmp.lt.s32.totalorder %s2948_s24, %s2948_s24 }
  0x76   : > { %p2951_p4 = pnand %p2949_p9, %p3296_p8  ;;  %p2958_p1 = por %p2957_p12, %p2956_p11 }
  0x78   : > { %p2952_p10 = pneg %p2951_p4 }
  0x7a   : > { %p2959_p3 = pnand %p2958_p1, %p2952_p10 }
  0x7c   : > { %2962 = shalt.err (!%p2959_p3)
}
  0x7d   : > { %s3820_s18 = smov 8   ;;  %s3821_s15 = smov 128  }
  0x7e   : > { %2743 = dma.hbm_to_vmem [thread:$0]  (!%p3280_p6), %s3781_s6, 2048, %s491_s25, [#allocation6], %s3821_s15, %s3821_s15, %s3820_s18  }
  0x7f   : > { %s2963_s11 = scalar_lea.hbm %s3785_s10, 2048 }
  0x80   : > { %p2964_p1 = scmp.ne.s32.totalorder %s3785_s10, %s2963_s11  ;;  %p2970_p0 = scmp.lt.u32.totalorder %s2963_s11, %s3785_s10 }
  0x82   : > { %p2966_p3 = pnand %p2964_p1, %p3296_p8 }
  0x84   : > { %p2967_p13 = pneg %p2966_p3 }
  0x86   : > { %p2972_p2 = pnand %p2970_p0, %p2967_p13 }
  0x88   : > { %2975 = shalt.err (!%p2972_p2)
}
  0x89   : > { %s2976_s17 = scalar_lea.vmem %s523_s0, 2048  ;;  %p2984_p4 = scmp.lt.s32.totalorder %s523_s0, %s523_s0 }
  0x8a   : > { %p2977_p5 = scmp.ne.s32.totalorder %s523_s0, %s2976_s17  ;;  %p2985_p10 = scmp.lt.s32.totalorder %s2976_s17, %s2976_s17 }
  0x8c   : > { %p2979_p7 = pnand %p2977_p5, %p3296_p8  ;;  %p2986_p11 = por %p2985_p10, %p2984_p4 }
  0x8e   : > { %p2980_p9 = pneg %p2979_p7 }
  0x90   : > { %p2987_p12 = pnand %p2986_p11, %p2980_p9 }
  0x92   : > { %2990 = shalt.err (!%p2987_p12)
}
  0x93   : > { %2749 = dma.hbm_to_vmem [thread:$0]  (!%p3280_p6), %s3785_s10, 2048, %s523_s0, [#allocation9], %s3821_s15, %s3821_s15, %s3820_s18  }
  0x94   : > { %s3138_s24 = smov [#allocation13]   ;;  %s2991_s9 = scalar_lea.hbm %s3791_s16, 4096 }
  0x95   : > { %s560_s4 = sshll.u32 %s3138_s24, 4  ;;  %p2992_p1 = scmp.ne.s32.totalorder %s3791_s16, %s2991_s9  ;;  %s561_s4 = int_to_ptr.vmem [resolvable:$true] %s560_s4 }
  0x96   : > { %p2998_p0 = scmp.lt.u32.totalorder %s2991_s9, %s3791_s16 }
  0x97   : > { %p2994_p3 = pnand %p2992_p1, %p3296_p8 }
  0x99   : > { %p2995_p13 = pneg %p2994_p3 }
  0x9b   : > { %p3000_p2 = pnand %p2998_p0, %p2995_p13 }
  0x9d   : > { %3003 = shalt.err (!%p3000_p2)
}
  0x9e   : > { %s3004_s0 = scalar_lea.vmem %s561_s4, 4096  ;;  %p3012_p4 = scmp.lt.s32.totalorder %s561_s4, %s561_s4 }
  0x9f   : > { %p3005_p5 = scmp.ne.s32.totalorder %s561_s4, %s3004_s0  ;;  %p3013_p10 = scmp.lt.s32.totalorder %s3004_s0, %s3004_s0 }
  0xa1   : > { %p3007_p7 = pnand %p3005_p5, %p3296_p8  ;;  %p3014_p11 = por %p3013_p10, %p3012_p4 }
  0xa3   : > { %p3008_p9 = pneg %p3007_p7 }
  0xa5   : > { %p3015_p12 = pnand %p3014_p11, %p3008_p9 }
  0xa7   : > { %3018 = shalt.err (!%p3015_p12)
}
  0xa8   : > { %2755 = dma.hbm_to_vmem [thread:$0]  (!%p3280_p6), %s3791_s16, 4096, %s561_s4, [#allocation12], %s3821_s15, %s3821_s15, %s3820_s18  }
  0xa9   : > { %s2205_s2 = sadd.s32 4294967294, %s3127_s30   ;;  %s3434_s21 = sadd.s32 1, %s3127_s30  }
  0xaa   : > { %s41_s25 = ssub.s32 %s3127_s30, %s3434_s21  ;;  %s44_s22 = sadd.s32 1, %s3123_s29 }
  0xab   : > { %p42_p8 = scmp.eq.s32.totalorder %s41_s25, 0  ;;  %p51_p1 = scmp.ne.s32.totalorder %s3123_s29, %s3119_s28 }
  0xac   : > { %p52_p3 = scmp.eq.s32.totalorder %s3127_s30, 0  ;;  %p57_p13 = scmp.ne.s32.totalorder %s3119_s28, %s3115_s27 }
  0xad   : > { %s3445_s24 = scalar_select %p42_p8, %s3123_s29, %s44_s22  }
  0xae   : > { %p3447_p0 = por %p52_p3, %p51_p1  ;;  %p3823_p2 = scmp.eq.s32.totalorder %s3264_s1, 0 }
  0xaf   : > { %p443_p5 = scmp.eq.s32.totalorder %s3264_s1, 1  ;;  %p449_p7 = scmp.eq.s32.totalorder %s2205_s2, 1 }
  0xb0   : > { %p3453_p6 = por %p3823_p2, %p57_p13  ;;  %p2770_p9 = scmp.lt.s32.totalorder %s3127_s30, 2 }
  0xb1   : > { %s577_s15 = sand.u32 1, %s3123_s29   ;;  %p3460_p4 = por %p443_p5, %p51_p1 }
  0xb2   : > { %p3464_p10 = por %p449_p7, %p57_p13  ;;  %s2214_s9 = sshll.u32 %s577_s15, 3 }
  0xb3   : > { %s3825_s4 = scalar_select %p3460_p4, 1, 0 }
  0xb4   : > { %s3826_s19 = scalar_select %p3464_p10, 1, 0 }
  0xb5   : > { %s2215_s11 = sshll.u32 %s3127_s30, 7  ;;  %s3827_s26 = sld [smem:[#allocation20_spill]] }
  0xb6   : > { %s581_s23 = scalar_lea.vmem [#allocation2], %s2214_s9  ;;  %p3478_p11 = pnand %p2770_p9, %p3447_p0 }
  0xb7   : > { %s588_s17 = sshll.u32 %s581_s23, 4  ;;  %s578_s25 = scalar_lea.sflag [#allocation3], %s577_s15  ;;  %s3474_s17 = int_to_ptr.vmem [resolvable:$true] %s588_s17 }
  0xb8   : > { %p3021_p8 = pneg %p3478_p11 }
  0xbb   : > { %s3472_s0 = scalar_lea.hbm %s3827_s26, %s2215_s11  ;;  %s3024_s12 = scalar_lea.hbm %s3827_s26, 256 }
  0xbc   : > { %s3019_s22 = scalar_lea.hbm %s3472_s0, 128  ;;  %p3025_p13 = scmp.lt.u32.totalorder %s3472_s0, %s3827_s26 }
  0xbd   : > { %p3020_p12 = scmp.ne.s32.totalorder %s3472_s0, %s3019_s22  ;;  %p3026_p0 = scmp.lt.u32.totalorder %s3024_s12, %s3019_s22 }
  0xbe   : > { %p3028_p5 = scmp.lt.u32.totalorder %s3019_s22, %s3472_s0 }
  0xbf   : > { %p3022_p1 = pnand %p3021_p8, %p3020_p12  ;;  %p3027_p2 = por %p3026_p0, %p3025_p13 }
  0xc1   : > { %p3023_p3 = pneg %p3022_p1  ;;  %p3029_p7 = por %p3028_p5, %p3027_p2 }
  0xc3   : > { %p3030_p9 = pnand %p3029_p7, %p3023_p3 }
  0xc5   : > { %3033 = shalt.err (!%p3030_p9)
}
  0xc6   : > { %s3034_s15 = scalar_lea.vmem %s3474_s17, 128  ;;  %s3139_s23 = smov [#allocation2]  }
  0xc7   : > { %p3035_p12 = scmp.ne.s32.totalorder %s3474_s17, %s3034_s15  ;;  %s3039_s9 = sshll.u32 %s3139_s23, 4  ;;  %s3040_s9 = int_to_ptr.vmem [resolvable:$false] %s3039_s9 }
  0xc8   : > { %s3041_s11 = scalar_lea.vmem %s3040_s9, 256  ;;  %p3042_p4 = scmp.lt.s32.totalorder %s3474_s17, %s3040_s9 }
  0xc9   : > { %p3037_p1 = pnand %p3035_p12, %p3021_p8  ;;  %p3043_p13 = scmp.lt.s32.totalorder %s3041_s11, %s3034_s15 }
  0xcb   : > { %p3038_p10 = pneg %p3037_p1  ;;  %p3044_p0 = por %p3043_p13, %p3042_p4 }
  0xcd   : > { %p3045_p2 = pnand %p3044_p0, %p3038_p10 }
  0xcf   : > { %3048 = shalt.err (!%p3045_p2)
}
  0xd0   : > { %2759 = dma.hbm_to_vmem [thread:$0]  (!%p3478_p11), %s3472_s0, 128, %s3474_s17, %s578_s25  }
  0xd1   : > { %p3829_p3 = scmp.ne.s32.totalorder %s3815_s20, 0 }
  0xd2   : > { %s3510_s22 = sand.u32 (!%p3829_p3), 1, %s3119_s28  }
  0xd3   : > { %603 = sbr.rel (%p3829_p3) target bundleno = 4217 (0x1079), region = 92  ;;  %s2217_s12 = sshll.u32 (!%p3829_p3), %s3510_s22, 3 }
  0xd4   : > { %s606_s8 = scalar_lea.sflag (!%p3829_p3), [#allocation3], %s3510_s22  ;;  %s609_s13 = scalar_lea.vmem (!%p3829_p3), [#allocation2], %s2217_s12 }
  0xda   : > { %3094 = dma.done.wait (%p3453_p6), %s606_s8, 128  }
  0xdb   : > { %3096 = vsyncadd (%p3453_p6), %s606_s8, 4294967168  ;;  %p3830_p4 = scmp.eq.s32.totalorder %s3264_s1, 0 }
  0xdd   : > { %3098 = dma.done.wait (%p3830_p4), [#allocation6], 4096   ;;  %p3831_p10 = pmov %p3830_p4 }
  0xde   : > { %p3832_p11 = pmov %p3830_p4 }
  0xdf   : > { %3100 = vsyncadd (%p3831_p10), [#allocation6], 4294963200 }
  0xe0   : > { %3102 = dma.done.wait (%p3832_p11), [#allocation9], 4096   ;;  %p3833_p8 = pmov %p3830_p4 }
  0xe1   : > { %p3834_p5 = pmov %p3830_p4 }
  0xe2   : > { %3104 = vsyncadd (%p3833_p8), [#allocation9], 4294963200 }
  0xe3   : > { %3106 = dma.done.wait (%p3834_p5), [#allocation12], 8192   ;;  %p3835_p7 = pmov %p3830_p4 }
  0xe4   : > { %v3532_v0 = vld [vmem:[%s609_s13] sm:$0xff]  ;;  %v730_v5 = vld [vmem:[#allocation5] sm:$0xff]  ;;  %v731_v6 = vld [vmem:[#allocation5 + $0x8] sm:$0xff]  ;;  %v3140_v10 = vmov 0.0|0.0   ;;  %vm3141_vm0 = vmmov 0   ;;  %v3142_v37 = vmov 0.0  }
  0xe5   : > { %3108 = vsyncadd (%p3835_p7), [#allocation12], 4294959104  ;;  %696 = vadd.xlane.f32.xlu0 %v3532_v0  ;;  %v2550_v7 = vpack.c.bf16 %v731_v6, %v730_v5  ;;  %v823_v8 = vld [vmem:[#allocation7] sm:$0xff]  ;;  %v824_v9 = vld [vmem:[#allocation7 + $0x8] sm:$0xff]  ;;  %2549 = vmatprep.subr.bf16.mxu0 %v3140_v10  ;;  %s3836_s0 = sld [smem:[#allocation22_spill]]  ;;  %vm1009_vm3 = vcmask 261120  }
  0xe6   : > { %2573 = vmatprep.subr.bf16.mxu1 %v3140_v10  ;;  %v2574_v11 = vpack.c.bf16 %v824_v9, %v823_v8  ;;  %v732_v12 = vld [vmem:[#allocation5 + $0x10] sm:$0xff]  ;;  %v733_v13 = vld [vmem:[#allocation5 + $0x18] sm:$0xff]  ;;  %v734_v18 = vld [vmem:[#allocation5 + $0x20] sm:$0xff]  ;;  %2401 = vmatprep.mubr.msk.f32.mxu0 %vm3141_vm0, %v3142_v37  ;;  %s3143_s11 = smov 96   ;;  %s3837_s20 = sld [smem:[#allocation25_spill]]  ;;  %vm1095_vm6 = vcmask 64512  }
  0xe7   : > { %2551 = vmatpush3.bf16.msra.mxu0 %v2550_v7  ;;  %v2553_v14 = vpack.c.bf16 %v733_v13, %v732_v12  ;;  %v825_v15 = vld [vmem:[#allocation7 + $0x10] sm:$0xff]  ;;  %v826_v16 = vld [vmem:[#allocation7 + $0x18] sm:$0xff]  ;;  %v735_v19 = vld [vmem:[#allocation5 + $0x28] sm:$0xff]  ;;  %2436 = vmatprep.mubr.msk.f32.mxu1 %vm3141_vm0, %v3142_v37  ;;  %p689_p6 = scmp.lt.s32.totalorder %s3264_s1, 1  ;;  %s3838_s2 = sld [smem:[#allocation21_spill]]  ;;  %vm1695_vm7 = vcmask 523264  }
  0xe8   : > { %2575 = vmatpush3.bf16.msra.mxu1 %v2574_v11  ;;  %2552 = vmatprep.subr.bf16.mxu0 %v3140_v10  ;;  %v2577_v17 = vpack.c.bf16 %v826_v16, %v825_v15  ;;  %v2556_v20 = vpack.c.bf16 %v735_v19, %v734_v18  ;;  %v827_v21 = vld [vmem:[#allocation7 + $0x20] sm:$0xff]  ;;  %v828_v22 = vld [vmem:[#allocation7 + $0x28] sm:$0xff]  ;;  %v736_v24 = vld [vmem:[#allocation5 + $0x30] sm:$0xff]  ;;  %s3145_s15 = smov 64   ;;  %s3146_s23 = smov 32   ;;  %vm1697_vm8 = vcmask 785408  }
  0xe9   : > { %2576 = vmatprep.subr.bf16.mxu1 %v3140_v10  ;;  %v2580_v23 = vpack.c.bf16 %v828_v22, %v827_v21  ;;  %v737_v25 = vld [vmem:[#allocation5 + $0x38] sm:$0xff]  ;;  %v829_v27 = vld [vmem:[#allocation7 + $0x30] sm:$0xff]  ;;  %v738_v30 = vld [vmem:[#allocation5 + $0x40] sm:$0xff]  ;;  %s690_s18 = scalar_select %p689_p6, %s3264_s1, 1 }
  0xea   : > { %v2559_v26 = vpack.c.bf16 %v737_v25, %v736_v24  ;;  %v830_v28 = vld [vmem:[#allocation7 + $0x38] sm:$0xff]  ;;  %v739_v31 = vld [vmem:[#allocation5 + $0x48] sm:$0xff]  ;;  %v831_v32 = vld [vmem:[#allocation7 + $0x40] sm:$0xff]  ;;  %s3839_s13 = sld [smem:[#allocation26_spill]]  ;;  %p3845_p12 = scmp.ne.s32.totalorder %s3825_s4, 0 }
  0xeb   : > { %2554 = vmatpush3.bf16.msra.mxu0 %v2553_v14  ;;  %v2583_v29 = vpack.c.bf16 %v830_v28, %v829_v27  ;;  %v2562_v33 = vpack.c.bf16 %v739_v31, %v738_v30  ;;  %v832_v34 = vld [vmem:[#allocation7 + $0x48] sm:$0xff]  ;;  %v740_v35 = vld [vmem:[#allocation5 + $0x50] sm:$0xff]  ;;  %v741_v36 = vld [vmem:[#allocation5 + $0x58] sm:$0xff] }
  0xec   : > { %2578 = vmatpush3.bf16.msra.mxu1 %v2577_v17  ;;  %2555 = vmatprep.subr.bf16.mxu0 %v3140_v10  ;;  %v2586_v38 = vpack.c.bf16 %v832_v34, %v831_v32  ;;  %v833_v39 = vld [vmem:[#allocation7 + $0x50] sm:$0xff]  ;;  %v834_v40 = vld [vmem:[#allocation7 + $0x58] sm:$0xff]  ;;  %v2565_v41 = vpack.c.bf16 %v741_v36, %v740_v35  ;;  %v742_v43 = vld [vmem:[#allocation5 + $0x60] sm:$0xff] }
  0xed   : > { %2579 = vmatprep.subr.bf16.mxu1 %v3140_v10  ;;  %v2589_v42 = vpack.c.bf16 %v834_v40, %v833_v39  ;;  %v743_v44 = vld [vmem:[#allocation5 + $0x68] sm:$0xff]  ;;  %v835_v45 = vld [vmem:[#allocation7 + $0x60] sm:$0xff]  ;;  %v744_v49 = vld [vmem:[#allocation5 + $0x70] sm:$0xff]  ;;  %s691_s25 = scalar_lea.vmem %s3838_s2, %s690_s18  ;;  %s3840_s18 = sld [smem:[#allocation27_spill]] }
  0xee   : > { %v836_v46 = vld [vmem:[#allocation7 + $0x68] sm:$0xff]  ;;  %v2568_v47 = vpack.c.bf16 %v743_v44, %v742_v43  ;;  %v745_v50 = vld [vmem:[#allocation5 + $0x78] sm:$0xff]  ;;  %v837_v51 = vld [vmem:[#allocation7 + $0x70] sm:$0xff]  ;;  %v1089_v44 = vlaneseq  ;;  %s3841_s2 = sld [smem:[#allocation28_spill]] }
  0xef   : > { %2557 = vmatpush3.bf16.msra.mxu0 %v2556_v20  ;;  %v2592_v48 = vpack.c.bf16 %v836_v46, %v835_v45  ;;  %v838_v52 = vld [vmem:[#allocation7 + $0x78] sm:$0xff]  ;;  %v2571_v53 = vpack.c.bf16 %v745_v50, %v744_v49  ;;  %v2225_v63 = vld [vmem:[%s3836_s0] ss:$0 sm:$0xff]  ;;  %v921_v14 = vld [vmem:[#allocation8 + $0x28] sm:$0xff] }
  0xf0   : > { %2581 = vmatpush3.bf16.msra.mxu1 %v2580_v23  ;;  %2558 = vmatprep.subr.bf16.mxu0 %v3140_v10  ;;  %v2595_v54 = vpack.c.bf16 %v838_v52, %v837_v51  ;;  %v2226_v6 = vld [vmem:[%s3778_s3] ss:$0 sm:$0xff]  ;;  %v919_v12 = vld [vmem:[#allocation8 + $0x18] sm:$0xff]  ;;  %v924_v19 = vld [vmem:[#allocation8 + $0x40] sm:$0xff]  ;;  %v3614_v46 = vshrl.u32 %v1089_v44, 7 }
  0xf1   : > { %2582 = vmatprep.subr.bf16.mxu1 %v3140_v10  ;;  %v918_v11 = vld [vmem:[#allocation8 + $0x10] sm:$0xff]  ;;  %v923_v17 = vld [vmem:[#allocation8 + $0x38] sm:$0xff]  ;;  %v925_v20 = vld [vmem:[#allocation8 + $0x48] sm:$0xff] }
  0xf2   : > { %v2601_v13 = vpack.c.bf16 %v919_v12, %v918_v11  ;;  %v922_v16 = vld [vmem:[#allocation8 + $0x30] sm:$0xff]  ;;  %v2610_v21 = vpack.c.bf16 %v925_v20, %v924_v19  ;;  %v927_v23 = vld [vmem:[#allocation8 + $0x58] sm:$0xff]  ;;  %v928_v25 = vld [vmem:[#allocation8 + $0x60] sm:$0xff] }
  0xf3   : > { %2560 = vmatpush3.bf16.msra.mxu0 %v2559_v26  ;;  %v2607_v18 = vpack.c.bf16 %v923_v17, %v922_v16  ;;  %v926_v22 = vld [vmem:[#allocation8 + $0x50] sm:$0xff]  ;;  %v929_v26 = vld [vmem:[#allocation8 + $0x68] sm:$0xff] }
  0xf4   : > { %2584 = vmatpush3.bf16.msra.mxu1 %v2583_v29  ;;  %2561 = vmatprep.subr.bf16.mxu0 %v3140_v10  ;;  %v2613_v24 = vpack.c.bf16 %v927_v23, %v926_v22  ;;  %v2616_v27 = vpack.c.bf16 %v929_v26, %v928_v25  ;;  %v930_v28 = vld [vmem:[#allocation8 + $0x70] sm:$0xff]  ;;  %v931_v29 = vld [vmem:[#allocation8 + $0x78] sm:$0xff] }
  0xf5   : > { %2585 = vmatprep.subr.bf16.mxu1 %v3140_v10  ;;  %v2619_v30 = vpack.c.bf16 %v931_v29, %v930_v28  ;;  %v2228_v31 = vld [vmem:[%s3782_s7] ss:$0 sm:$0xff] }
  0xf6   : > { %v2227_v34 = vld [vmem:[%s3780_s5] ss:$0 sm:$0xff] }
  0xf7   : > { %2563 = vmatpush3.bf16.msra.mxu0 %v2562_v33  ;;  %v2229_v40 = vld [vmem:[%s3837_s20] ss:$0 sm:$0xff]  ;;  %s688_s20 = scalar_lea.vmem [#allocation14], %s2217_s12 }
  0xf8   : > { %2587 = vmatpush3.bf16.msra.mxu1 %v2586_v38  ;;  %2564 = vmatprep.subr.bf16.mxu0 %v3140_v10  ;;  %v693_v45 = vld [vmem:[%s691_s25] sm:$0x1] }
  0xf9   : > { %2588 = vmatprep.subr.bf16.mxu1 %v3140_v10  ;;  %vm1087_vm4 = vcmp.gt.f32.partialorder %v693_v45, 0.0 }
  0xfb   : > { %2566 = vmatpush3.bf16.msra.mxu0 %v2565_v41 }
  0xfc   : > { %2590 = vmatpush3.bf16.msra.mxu1 %v2589_v42  ;;  %2567 = vmatprep.subr.bf16.mxu0 %v3140_v10 }
  0xfd   : > { %2591 = vmatprep.subr.bf16.mxu1 %v3140_v10 }
  0xff   : > { %2569 = vmatpush3.bf16.msra.mxu0 %v2568_v47  ;;  %v1091_v47 = vsub.s32 0, %v3614_v46 }
 0x100   : > { %2593 = vmatpush3.bf16.msra.mxu1 %v2592_v48  ;;  %2570 = vmatprep.subr.bf16.mxu0 %v3140_v10  ;;  %v3144_v48 = vmov 0  }
 0x101   : > { %2594 = vmatprep.subr.bf16.mxu1 %v3140_v10  ;;  %v1088_v49 = vsel %vm1087_vm4, 1, %v3144_v48 }
 0x102   : > { %v3619_v50 = vrot.slane %v1088_v49, %v1091_v47 }
 0x103   : > { %2572 = vmatpush3.bf16.msra.mxu0 %v2571_v53 }
 0x104   : > { %2596 = vmatpush3.bf16.msra.mxu1 %v2595_v54  ;;  %2597 = vmatprep.subr.bf16.mxu0 %v3140_v10  ;;  %vm1093_vm5 = vcmp.eq.s32.totalorder %v3619_v50, 1 }
 0x105   : > { %2474 = vmatprep.subr.mxu1 %v3142_v37 }
 0x172   : > { %v697_v1 = vpop.xlane.xlu0 %696 }
 0x173   : > { %v699_v2 = vmul.f32 0.0078125, %v697_v1 }
 0x175   : > { %v3536_v3 = vsub.f32 %v3532_v0, %v699_v2  ;;  %v916_v2 = vld [vmem:[#allocation8] sm:$0xff] }
 0x177   : > { %v701_v4 = vmul.f32 %v3536_v3, %v3536_v3  ;;  %v719_v1 = vmul.f32 %v2225_v63, %v3536_v3  ;;  %v920_v3 = vld [vmem:[#allocation8 + $0x20] sm:$0xff] }
 0x178   : > { %v2604_v15 = vpack.c.bf16 %v921_v14, %v920_v3 }
 0x179   : > { %702 = vadd.xlane.f32.xlu0 %v701_v4  ;;  %v917_v4 = vld [vmem:[#allocation8 + $0x8] sm:$0xff] }
 0x17a   : > { %v2598_v8 = vpack.c.bf16 %v917_v4, %v916_v2 }
 0x206   : > { %v703_v55 = vpop.xlane.xlu0 %702 }
 0x207   : > { %v705_v56 = vmul.f32 0.007874016, %v703_v55 }
 0x209   : > { %2827 = vrsqrt.f32 %v705_v56  ;;  %vm708_vm1 = vcmp.eq.f32.partialorder %v705_v56, inf  ;;  %v711_v59 = vand.u32 2147483648, %v705_v56  ;;  %vm710_vm2 = vcmp.eq.f32.partialorder %v705_v56, 0.0 }
 0x213   : > { %v2828_v57 = vpop.eup %2827 }
 0x214   : > { %v707_v58 = vmul.f32 %v2828_v57, %v705_v56 }
 0x216   : > { %v709_v60 = vsel %vm708_vm1, %v705_v56, %v707_v58 }
 0x217   : > { %v712_v61 = vsel %vm710_vm2, %v711_v59, %v709_v60 }
 0x218   : > { %v720_v62 = vadd.f32 1e-06, %v712_v61 }
 0x21a   : > { %2829 = vrcp.f32 %v720_v62 }
 0x224   : > { %v2830_v5 = vpop.eup %2829 }
 0x225   : > { %v722_v7 = vmul.f32 %v2830_v5, %v719_v1 }
 0x227   : > { %v729_v9 = vadd.f32 %v2226_v6, %v722_v7 }
 0x229   : > { %2402 = vmatmul.mubr.f32.vlgmr.msra.gmra.mrb[0].mxu0 %v729_v9  ;;  %2437 = vmatmul.mubr.f32.vlgmr.msra.gmra.mrb[0].mxu1 %v729_v9 }
 0x22a   : > { %2599 = vmatpush3.bf16.msra.mxu0 %v2598_v8  ;;  %2471 = vmatprep.mubr.msk.f32.mxu0 %vm3141_vm0, %v3142_v37 }
 0x22b   : > { %2600 = vmatprep.subr.bf16.mxu0 %v3140_v10  ;;  %2476 = vmatprep.mubr.msk.f32.mxu1 %vm3141_vm0, %v3142_v37 }
 0x22e   : > { %2602 = vmatpush3.bf16.msra.mxu0 %v2601_v13 }
 0x22f   : > { %2603 = vmatprep.subr.bf16.mxu0 %v3140_v10 }
 0x232   : > { %2605 = vmatpush3.bf16.msra.mxu0 %v2604_v15 }
 0x233   : > { %2606 = vmatprep.subr.bf16.mxu0 %v3140_v10 }
 0x236   : > { %2608 = vmatpush3.bf16.msra.mxu0 %v2607_v18 }
 0x237   : > { %2609 = vmatprep.subr.bf16.mxu0 %v3140_v10 }
 0x23a   : > { %2611 = vmatpush3.bf16.msra.mxu0 %v2610_v21 }
 0x23b   : > { %2612 = vmatprep.subr.bf16.mxu0 %v3140_v10 }
 0x23e   : > { %2614 = vmatpush3.bf16.msra.mxu0 %v2613_v24 }
 0x23f   : > { %2615 = vmatprep.subr.bf16.mxu0 %v3140_v10 }
 0x242   : > { %2617 = vmatpush3.bf16.msra.mxu0 %v2616_v27 }
 0x243   : > { %2618 = vmatprep.subr.bf16.mxu0 %v3140_v10 }
 0x246   : > { %2620 = vmatpush3.bf16.msra.mxu0 %v2619_v30 }
 0x247   : > { %2621 = vmatprep.subr.bf16.mxu0 %v3140_v10 }
 0x249   : > { %2472 = vmatmul.mubr.f32.vlgmr.msra.gmra.mrb[2].mxu0 %v729_v9 }
 0x24a   : > { %2546 = vmatprep.mubr.msk.f32.mxu0 %vm3141_vm0, %v3142_v37 }
 0x2fc   : > { %v819_v32 = vpop.f32.mrb[0].mxu0  ;;  %v912_v33 = vpop.f32.mrb[0].mxu1 }
 0x2fd   : > { %v3589_v35 = vadd.f32 %v2228_v31, %v912_v33  ;;  %v2403_v36 = vpop.f32.mrb[1].mxu0  ;;  %v2438_v38 = vpop.f32.mrb[1].mxu1  ;;  %v3595_v39 = vadd.f32 %v2227_v34, %v819_v32 }
 0x2ff   : > { %1182 = vrot.lane.b32.xlu0 %v3589_v35, %s3143_s11  ;;  %2475 = vmatpush3.xpose.msk.msra.mxu1 %vm1009_vm3, %v3589_v35 }
 0x300   : > { %2479 = vmatprep.subr.mxu1 %v3142_v37 }
 0x302   : > { %2477 = vmatmul.mubr.msk.f32.vlgmr.msra.gmra.mrb[2].mxu1 %vm1009_vm3, %v3595_v39 }
 0x303   : > { %2481 = vmatprep.mubr.msk.f32.mxu1 %vm3141_vm0, %v3142_v37 }
 0x31c   : > { %v1005_v41 = vpop.f32.mrb[2].mxu0 }
 0x31d   : > { %v3605_v42 = vadd.f32 %v2229_v40, %v1005_v41  ;;  %v2473_v43 = vpop.f32.mrb[3].mxu0 }
 0x31f   : > { %2480 = vmatpush3.msra.mxu1 %v3605_v42 }
 0x320   : > { %2484 = vmatprep.subr.mxu1 %v3142_v37 }
 0x371   : > { %v1183_v1 = vpop.permute.xlu0 %1182 }
 0x3d5   : > { %v1082_v51 = vpop.f32.mrb[2].mxu1 }
 0x3d6   : > { %v1086_v52 = vmul.f32 0.17677669, %v1082_v51  ;;  %v2478_v53 = vpop.f32.mrb[3].mxu1 }
 0x3d8   : > { %v1094_v54 = vsel %vm1093_vm5, %v1086_v52, -1e+09 }
 0x3d9   : > { %v1096_v55 = vsel %vm1095_vm6, %v1094_v54, -inf }
 0x3da   : > { %1097 = vmax.xlane.f32.xlu1 %v1096_v55 }
 0x467   : > { %v1098_v56 = vpop.xlane.xlu1 %1097 }
 0x468   : > { %v1099_v57 = vsub.f32 %v1094_v54, %v1098_v56 }
 0x46a   : > { %v1100_v58 = vmul.f32 1.442695, %v1099_v57 }
 0x46c   : > { %2831 = vpow2.f32 %v1100_v58 }
 0x476   : > { %v2832_v59 = vpop.eup %2831 }
 0x477   : > { %v1102_v60 = vsel %vm1095_vm6, %v2832_v59, 0.0 }
 0x478   : > { %1103 = vadd.xlane.f32.xlu1 %v1102_v60  ;;  %v1700_v60 = vld [vmem:[#allocation10 + $0x8] sm:$0xff] }
 0x489   : > { %1180 = vrot.lane.b32.xlu1 %v3595_v39, %s3143_s11 }
 0x505   : > { %v1104_v61 = vpop.xlane.xlu1 %1103 }
 0x506   : > { %2833 = vrcp.f32 %v1104_v61  ;;  %v1701_v61 = vld [vmem:[#allocation10 + $0x10] sm:$0xff] }
 0x509   : > { %v1181_v2 = vpop.permute.xlu1 %1180 }
 0x510   : > { %v2834_v62 = vpop.eup %2833 }
 0x511   : > { %v1106_v63 = vmul.f32 %v2834_v62, %v2832_v59 }
 0x513   : > { %2482 = vmatmul.mubr.msk.f32.vlgmr.msra.gmra.mrb[4].mxu1 %vm1095_vm6, %v1106_v63  ;;  %v1702_v63 = vld [vmem:[#allocation10 + $0x18] sm:$0xff] }
 0x514   : > { %2485 = vmatpush3.xpose.msk.msra.mxu1 %vm1009_vm3, %v1183_v1  ;;  %2486 = vmatprep.mubr.msk.f32.mxu1 %vm3141_vm0, %v3142_v37  ;;  %v2625_v1 = vpack.c.bf16 %v1702_v63, %v1701_v61  ;;  %v1846_v63 = vld [vmem:[#allocation11 + $0x98] sm:$0xff] }
 0x515   : > { %2489 = vmatprep.subr.mxu1 %v3142_v37 }
 0x517   : > { %2487 = vmatmul.mubr.msk.f32.vlgmr.msra.gmra.mrb[6].mxu1 %vm1009_vm3, %v1181_v2  ;;  %v1703_v2 = vld [vmem:[#allocation10 + $0x20] sm:$0xff] }
 0x518   : > { %2491 = vmatprep.mubr.msk.f32.mxu1 %vm3141_vm0, %v3142_v37 }
 0x5e6   : > { %v3636_v4 = vpop.f32.mrb[4].mxu1 }
 0x5e7   : > { %v2483_v5 = vpop.f32.mrb[5].mxu1 }
 0x5e8   : > { %v1704_v5 = vld [vmem:[#allocation10 + $0x28] sm:$0xff] }
 0x5ea   : > { %v1254_v6 = vpop.f32.mrb[6].mxu1 }
 0x5eb   : > { %v1258_v7 = vmul.f32 0.17677669, %v1254_v6  ;;  %v2488_v8 = vpop.f32.mrb[7].mxu1  ;;  %v2628_v6 = vpack.c.bf16 %v1704_v5, %v1703_v2  ;;  %v1843_v2 = vld [vmem:[#allocation11 + $0x80] sm:$0xff]  ;;  %v1845_v5 = vld [vmem:[#allocation11 + $0x90] sm:$0xff] }
 0x5ec   : > { %v1706_v8 = vld [vmem:[#allocation10 + $0x38] sm:$0xff] }
 0x5ed   : > { %v1259_v9 = vsel %vm1093_vm5, %v1258_v7, -1e+09  ;;  %v1705_v7 = vld [vmem:[#allocation10 + $0x30] sm:$0xff] }
 0x5ee   : > { %v1260_v11 = vsel %vm1095_vm6, %v1259_v9, -inf }
 0x5ef   : > { %1261 = vmax.xlane.f32.xlu1 %v1260_v11  ;;  %v1708_v11 = vld [vmem:[#allocation10 + $0x48] sm:$0xff] }
 0x600   : > { %1350 = vrot.lane.b32.xlu1 %v3589_v35, %s3145_s15 }
 0x604   : > { %1348 = vrot.lane.b32.xlu1 %v3595_v39, %s3145_s15 }
 0x67c   : > { %v1262_v12 = vpop.xlane.xlu1 %1261 }
 0x67d   : > { %v1263_v13 = vsub.f32 %v1259_v9, %v1262_v12  ;;  %v2631_v9 = vpack.c.bf16 %v1706_v8, %v1705_v7  ;;  %v2663_v7 = vpack.c.bf16 %v1845_v5, %v1843_v2  ;;  %v1850_v8 = vld [vmem:[#allocation11 + $0xb8] sm:$0xff] }
 0x67f   : > { %v1264_v3 = vmul.f32 1.442695, %v1263_v13  ;;  %v1709_v13 = vld [vmem:[#allocation10 + $0x50] sm:$0xff] }
 0x680   : > { %v1351_v19 = vpop.permute.xlu1 %1350 }
 0x681   : > { %2835 = vpow2.f32 %v1264_v3  ;;  %v1710_v3 = vld [vmem:[#allocation10 + $0x58] sm:$0xff] }
 0x684   : > { %v1349_v21 = vpop.permute.xlu1 %1348 }
 0x68b   : > { %v2836_v14 = vpop.eup %2835 }
 0x68c   : > { %v1266_v15 = vsel %vm1095_vm6, %v2836_v14, 0.0 }
 0x68d   : > { %1267 = vadd.xlane.f32.xlu0 %v1266_v15  ;;  %v1711_v15 = vld [vmem:[#allocation10 + $0x60] sm:$0xff] }
 0x6a3   : > { %1272 = vrot.lane.b32.xlu0 %v3605_v42, %s3143_s11 }
 0x71a   : > { %v1268_v16 = vpop.xlane.xlu0 %1267 }
 0x71b   : > { %2837 = vrcp.f32 %v1268_v16  ;;  %v1712_v16 = vld [vmem:[#allocation10 + $0x68] sm:$0xff] }
 0x71e   : > { %v1273_v17 = vpop.permute.xlu0 %1272 }
 0x71f   : > { %2490 = vmatpush3.msra.mxu1 %v1273_v17  ;;  %v2640_v17 = vpack.c.bf16 %v1712_v16, %v1711_v15  ;;  %v1851_v15 = vld [vmem:[#allocation11 + $0xc0] sm:$0xff]  ;;  %v1853_v16 = vld [vmem:[#allocation11 + $0xd0] sm:$0xff] }
 0x720   : > { %2494 = vmatprep.subr.mxu1 %v3142_v37 }
 0x725   : > { %v2838_v18 = vpop.eup %2837 }
 0x726   : > { %v1270_v20 = vmul.f32 %v2838_v18, %v2836_v14  ;;  %v2637_v14 = vpack.c.bf16 %v1710_v3, %v1709_v13  ;;  %v1713_v18 = vld [vmem:[#allocation10 + $0x70] sm:$0xff]  ;;  %v1854_v13 = vld [vmem:[#allocation11 + $0xd8] sm:$0xff] }
 0x728   : > { %2492 = vmatmul.mubr.msk.f32.vlgmr.msra.gmra.mrb[8].mxu1 %vm1095_vm6, %v1270_v20 }
 0x729   : > { %2495 = vmatpush3.xpose.msk.msra.mxu1 %vm1009_vm3, %v1351_v19  ;;  %2496 = vmatprep.mubr.msk.f32.mxu1 %vm3141_vm0, %v3142_v37  ;;  %v1714_v19 = vld [vmem:[#allocation10 + $0x78] sm:$0xff] }
 0x72a   : > { %2499 = vmatprep.subr.mxu1 %v3142_v37  ;;  %v2643_v20 = vpack.c.bf16 %v1714_v19, %v1713_v18  ;;  %v1858_v18 = vld [vmem:[#allocation11 + $0xf8] sm:$0xff]  ;;  %v2671_v19 = vpack.c.bf16 %v1853_v16, %v1851_v15 }
 0x72c   : > { %2497 = vmatmul.mubr.msk.f32.vlgmr.msra.gmra.mrb[10].mxu1 %vm1009_vm3, %v1349_v21 }
 0x72d   : > { %2501 = vmatprep.mubr.msk.f32.mxu1 %vm3141_vm0, %v3142_v37 }
 0x7fb   : > { %v1344_v22 = vpop.f32.mrb[8].mxu1 }
 0x7fc   : > { %v2493_v23 = vpop.f32.mrb[9].mxu1 }
 0x7ff   : > { %v1422_v24 = vpop.f32.mrb[10].mxu1 }
 0x800   : > { %v1426_v25 = vmul.f32 0.17677669, %v1422_v24  ;;  %v2498_v26 = vpop.f32.mrb[11].mxu1 }
 0x802   : > { %v1427_v27 = vsel %vm1093_vm5, %v1426_v25, -1e+09 }
 0x803   : > { %v1428_v28 = vsel %vm1095_vm6, %v1427_v27, -inf }
 0x804   : > { %1429 = vmax.xlane.f32.xlu1 %v1428_v28 }
 0x815   : > { %1517 = vrot.lane.b32.xlu1 %v3589_v35, %s3146_s23 }
 0x819   : > { %1515 = vrot.lane.b32.xlu1 %v3595_v39, %s3146_s23 }
 0x891   : > { %v1430_v29 = vpop.xlane.xlu1 %1429 }
 0x892   : > { %v1431_v30 = vsub.f32 %v1427_v27, %v1430_v29 }
 0x894   : > { %v1432_v31 = vmul.f32 1.442695, %v1431_v30 }
 0x895   : > { %v1518_v38 = vpop.permute.xlu1 %1517 }
 0x896   : > { %2839 = vpow2.f32 %v1432_v31 }
 0x899   : > { %v1516_v40 = vpop.permute.xlu1 %1515 }
 0x8a0   : > { %v2840_v32 = vpop.eup %2839 }
 0x8a1   : > { %v1434_v33 = vsel %vm1095_vm6, %v2840_v32, 0.0 }
 0x8a2   : > { %1435 = vadd.xlane.f32.xlu0 %v1434_v33 }
 0x8b8   : > { %1439 = vrot.lane.b32.xlu0 %v3605_v42, %s3145_s15 }
 0x92f   : > { %v1436_v34 = vpop.xlane.xlu0 %1435 }
 0x930   : > { %2841 = vrcp.f32 %v1436_v34 }
 0x933   : > { %v1440_v36 = vpop.permute.xlu0 %1439 }
 0x934   : > { %2500 = vmatpush3.msra.mxu1 %v1440_v36 }
 0x935   : > { %2504 = vmatprep.subr.mxu1 %v3142_v37 }
 0x93a   : > { %v2842_v35 = vpop.eup %2841 }
 0x93b   : > { %v1438_v39 = vmul.f32 %v2842_v35, %v2840_v32  ;;  %v1828_v35 = vld [vmem:[#allocation11 + $0x8] sm:$0xff] }
 0x93d   : > { %2502 = vmatmul.mubr.msk.f32.vlgmr.msra.gmra.mrb[12].mxu1 %vm1095_vm6, %v1438_v39 }
 0x93e   : > { %2505 = vmatpush3.xpose.msk.msra.mxu1 %vm1009_vm3, %v1518_v38  ;;  %2506 = vmatprep.mubr.msk.f32.mxu1 %vm3141_vm0, %v3142_v37  ;;  %v1830_v38 = vld [vmem:[#allocation11 + $0x18] sm:$0xff] }
 0x93f   : > { %2509 = vmatprep.subr.mxu1 %v3142_v37  ;;  %v2645_v39 = vpack.c.bf16 %v1830_v38, %v1828_v35  ;;  %v1965_v35 = vld [vmem:[#allocation13 + $0xa8] sm:$0xff] }
 0x941   : > { %2507 = vmatmul.mubr.msk.f32.vlgmr.msra.gmra.mrb[14].mxu1 %vm1009_vm3, %v1516_v40  ;;  %v1827_v40 = vld [vmem:[#allocation11] sm:$0xff] }
 0x942   : > { %2511 = vmatprep.mubr.msk.f32.mxu1 %vm3141_vm0, %v3142_v37 }
 0xa10   : > { %v1511_v41 = vpop.f32.mrb[12].mxu1 }
 0xa11   : > { %v2503_v43 = vpop.f32.mrb[13].mxu1 }
 0xa14   : > { %v1589_v44 = vpop.f32.mrb[14].mxu1 }
 0xa15   : > { %v1593_v45 = vmul.f32 0.17677669, %v1589_v44  ;;  %v2508_v48 = vpop.f32.mrb[15].mxu1  ;;  %v1834_v44 = vld [vmem:[#allocation11 + $0x38] sm:$0xff] }
 0xa16   : > { %v1831_v48 = vld [vmem:[#allocation11 + $0x20] sm:$0xff] }
 0xa17   : > { %v1594_v49 = vsel %vm1093_vm5, %v1593_v45, -1e+09 }
 0xa18   : > { %v1595_v51 = vsel %vm1095_vm6, %v1594_v49, -inf }
 0xa19   : > { %1596 = vmax.xlane.f32.xlu0 %v1595_v51 }
 0xa2f   : > { %1606 = vrot.lane.b32.xlu0 %v3605_v42, %s3146_s23  ;;  %v1699_v42 = vld [vmem:[#allocation10] sm:$0xff] }
 0xa30   : > { %v2622_v62 = vpack.c.bf16 %v1700_v60, %v1699_v42  ;;  %v1839_v42 = vld [vmem:[#allocation11 + $0x60] sm:$0xff]  ;;  %v1841_v60 = vld [vmem:[#allocation11 + $0x70] sm:$0xff] }
 0xa31   : > { %v2659_v61 = vpack.c.bf16 %v1841_v60, %v1839_v42  ;;  %v1954_v42 = vld [vmem:[#allocation13 + $0x50] sm:$0xff]  ;;  %v1955_v60 = vld [vmem:[#allocation13 + $0x58] sm:$0xff] }
 0xa32   : > { %2623 = vmatpush3.bf16.msra.mxu0 %v2622_v62  ;;  %v1844_v62 = vld [vmem:[#allocation11 + $0x88] sm:$0xff] }
 0xa33   : > { %1687 = vrot.lane.b32.xlu0 %v1511_v41, %s3145_s15  ;;  %2624 = vmatprep.subr.bf16.mxu0 %v3140_v10  ;;  %v1829_v41 = vld [vmem:[#allocation11 + $0x10] sm:$0xff]  ;;  %s2056_s15 = scalar_lea.sflag [#allocation4], %s3510_s22 }
 0xa34   : > { %v2647_v43 = vpack.c.bf16 %v1829_v41, %v1827_v40  ;;  %v1948_v40 = vld [vmem:[#allocation13 + $0x20] sm:$0xff]  ;;  %v1949_v41 = vld [vmem:[#allocation13 + $0x28] sm:$0xff] }
 0xa36   : > { %2626 = vmatpush3.bf16.msra.mxu0 %v2625_v1  ;;  %v2661_v1 = vpack.c.bf16 %v1846_v63, %v1844_v62  ;;  %v1973_v62 = vld [vmem:[#allocation13 + $0xe8] sm:$0xff]  ;;  %v2699_v63 = vpack.c.bf16 %v1955_v60, %v1954_v42 }
 0xa37   : > { %2627 = vmatprep.subr.bf16.mxu0 %v3140_v10 }
 0xa3a   : > { %2629 = vmatpush3.bf16.msra.mxu0 %v2628_v6  ;;  %v1848_v6 = vld [vmem:[#allocation11 + $0xa8] sm:$0xff] }
 0xa3b   : > { %2630 = vmatprep.subr.bf16.mxu0 %v3140_v10 }
 0xa3e   : > { %2632 = vmatpush3.bf16.msra.mxu0 %v2631_v9  ;;  %v1847_v9 = vld [vmem:[#allocation11 + $0xa0] sm:$0xff] }
 0xa3f   : > { %2633 = vmatprep.subr.bf16.mxu0 %v3140_v10 }
 0xaa6   : > { %v1597_v52 = vpop.xlane.xlu0 %1596 }
 0xaa7   : > { %v1598_v53 = vsub.f32 %v1594_v49, %v1597_v52  ;;  %v1833_v49 = vld [vmem:[#allocation11 + $0x30] sm:$0xff]  ;;  %v1836_v52 = vld [vmem:[#allocation11 + $0x48] sm:$0xff] }
 0xaa8   : > { %v2651_v51 = vpack.c.bf16 %v1833_v49, %v1831_v48  ;;  %v1950_v48 = vld [vmem:[#allocation13 + $0x30] sm:$0xff]  ;;  %v1951_v49 = vld [vmem:[#allocation13 + $0x38] sm:$0xff] }
 0xaa9   : > { %v1599_v54 = vmul.f32 1.442695, %v1598_v53  ;;  %v1838_v53 = vld [vmem:[#allocation11 + $0x58] sm:$0xff] }
 0xaaa   : > { %v1607_v55 = vpop.permute.xlu0 %1606 }
 0xaab   : > { %2843 = vpow2.f32 %v1599_v54  ;;  %2510 = vmatpush3.msra.mxu1 %v1607_v55  ;;  %v2653_v54 = vpack.c.bf16 %v1838_v53, %v1836_v52  ;;  %v1835_v55 = vld [vmem:[#allocation11 + $0x40] sm:$0xff]  ;;  %v1969_v52 = vld [vmem:[#allocation13 + $0xc8] sm:$0xff]  ;;  %v2691_v53 = vpack.c.bf16 %v1951_v49, %v1950_v48 }
 0xaac   : > { %2646 = vmatprep.subr.bf16.mxu1 %v2645_v39 }
 0xaae   : > { %v1688_v25 = vpop.permute.xlu0 %1687 }
 0xab5   : > { %v2844_v56 = vpop.eup %2843 }
 0xab6   : > { %v1601_v57 = vsel %vm1095_vm6, %v2844_v56, 0.0 }
 0xab7   : > { %1602 = vadd.xlane.f32.xlu1 %v1601_v57 }
 0xac8   : > { %1683 = vrot.lane.b32.xlu1 %v1344_v22, %s3146_s23  ;;  %s3842_s23 = sld [smem:[#allocation29_spill]] }
 0xb44   : > { %v1603_v50 = vpop.xlane.xlu1 %1602 }
 0xb45   : > { %2845 = vrcp.f32 %v1603_v50  ;;  %v1840_v50 = vld [vmem:[#allocation11 + $0x68] sm:$0xff] }
 0xb48   : > { %v1684_v23 = vpop.permute.xlu1 %1683 }
 0xb49   : > { %v1694_v24 = vsel %vm1009_vm3, %v3636_v4, %v1684_v23 }
 0xb4a   : > { %v1696_v26 = vsel %vm1695_vm7, %v1694_v24, %v1688_v25  ;;  %v1960_v24 = vld [vmem:[#allocation13 + $0x80] sm:$0xff]  ;;  %v1961_v25 = vld [vmem:[#allocation13 + $0x88] sm:$0xff] }
 0xb4f   : > { %v2846_v58 = vpop.eup %2845 }
 0xb50   : > { %v1605_v59 = vmul.f32 %v2846_v58, %v2844_v56  ;;  %v1837_v56 = vld [vmem:[#allocation11 + $0x50] sm:$0xff]  ;;  %v1842_v58 = vld [vmem:[#allocation11 + $0x78] sm:$0xff] }
 0xb51   : > { %v2655_v57 = vpack.c.bf16 %v1837_v56, %v1835_v55  ;;  %v1952_v55 = vld [vmem:[#allocation13 + $0x40] sm:$0xff]  ;;  %v1953_v56 = vld [vmem:[#allocation13 + $0x48] sm:$0xff] }
 0xb52   : > { %2512 = vmatmul.mubr.msk.f32.vlgmr.msra.gmra.mrb[16].mxu1 %vm1095_vm6, %v1605_v59  ;;  %v2657_v59 = vpack.c.bf16 %v1842_v58, %v1840_v50  ;;  %v1971_v50 = vld [vmem:[#allocation13 + $0xd8] sm:$0xff]  ;;  %v2695_v58 = vpack.c.bf16 %v1953_v56, %v1952_v55 }
 0xb53   : > { %1935 = vmatprep.mubr.f32.mxu1 %v3142_v37  ;;  %v1707_v37 = vld [vmem:[#allocation10 + $0x40] sm:$0xff]  ;;  %2648 = vmatpush1.bf16.msra.mxu1 %v2647_v43  ;;  %v1966_v43 = vld [vmem:[#allocation13 + $0xb0] sm:$0xff] }
 0xb54   : > { %v2634_v12 = vpack.c.bf16 %v1708_v11, %v1707_v37  ;;  %v1849_v37 = vld [vmem:[#allocation11 + $0xb0] sm:$0xff]  ;;  %v2665_v11 = vpack.c.bf16 %v1850_v8, %v1848_v6 }
 0xb55   : > { %v2667_v3 = vpack.c.bf16 %v1849_v37, %v1847_v9 }
 0xb56   : > { %2635 = vmatpush3.bf16.msra.mxu0 %v2634_v12  ;;  %v1852_v12 = vld [vmem:[#allocation11 + $0xc8] sm:$0xff] }
 0xb57   : > { %2636 = vmatprep.subr.bf16.mxu0 %v3140_v10 }
 0xb5a   : > { %2638 = vmatpush3.bf16.msra.mxu0 %v2637_v14  ;;  %v2669_v14 = vpack.c.bf16 %v1854_v13, %v1852_v12  ;;  %v2243_v12 = vld [vmem:[%s3840_s18] ss:$0 sm:$0xff]  ;;  %s2069_s18 = sshll.u32 %s688_s20, 4  ;;  %s3733_s18 = int_to_ptr.vmem [resolvable:$true] %s2069_s18 }
 0xb5b   : > { %2639 = vmatprep.subr.bf16.mxu0 %v3140_v10 }
 0xb5e   : > { %2641 = vmatpush3.bf16.msra.mxu0 %v2640_v17  ;;  %v1856_v17 = vld [vmem:[#allocation11 + $0xe8] sm:$0xff] }
 0xb5f   : > { %2642 = vmatprep.subr.bf16.mxu0 %v3140_v10  ;;  %v2242_v10 = vld [vmem:[%s3839_s13] ss:$0 sm:$0xff]  ;;  %s3843_s13 = sld [smem:[#allocation30_spill]] }
 0xb62   : > { %2644 = vmatpush3.bf16.msra.mxu0 %v2643_v20  ;;  %v2673_v20 = vpack.c.bf16 %v1858_v18, %v1856_v17  ;;  %v1956_v17 = vld [vmem:[#allocation13 + $0x60] sm:$0xff]  ;;  %v1957_v18 = vld [vmem:[#allocation13 + $0x68] sm:$0xff] }
 0xc25   : > { %v1678_v21 = vpop.f32.mrb[16].mxu1 }
 0xc26   : > { %1691 = vrot.lane.b32.xlu1 %v1678_v21, %s3143_s11  ;;  %v2513_v22 = vpop.f32.mrb[17].mxu1  ;;  %v1855_v21 = vld [vmem:[#allocation11 + $0xe0] sm:$0xff]  ;;  %s2247_s11 = sshll.u32 %s3264_s1, 7  ;;  %s3147_s1 = smov [#allocation14]  }
 0xc27   : > { %v1857_v22 = vld [vmem:[#allocation11 + $0xf0] sm:$0xff]  ;;  %s3053_s12 = sshll.u32 %s3147_s1, 4  ;;  %s3054_s12 = int_to_ptr.vmem [resolvable:$false] %s3053_s12 }
 0xc28   : > { %v2675_v23 = vpack.c.bf16 %v1857_v22, %v1855_v21  ;;  %v1975_v21 = vld [vmem:[#allocation13 + $0xf8] sm:$0xff]  ;;  %s3055_s9 = scalar_lea.vmem %s3054_s12, 256  ;;  %p3056_p0 = scmp.lt.s32.totalorder %s3733_s18, %s3054_s12 }
 0xc98   : > { %v1692_v27 = vpop.permute.xlu1 %1691 }
 0xc99   : > { %v1698_v28 = vsel %vm1697_vm8, %v1696_v26, %v1692_v27  ;;  %v1944_v26 = vld [vmem:[#allocation13] sm:$0xff]  ;;  %v2677_v27 = vpack.c.bf16 %v1961_v25, %v1960_v24  ;;  %v1959_v24 = vld [vmem:[#allocation13 + $0x78] sm:$0xff] }
 0xc9a   : > { %2547 = vmatmul.mubr.f32.vlgmr.msra.gmra.mrb[4].mxu0 %v1698_v28  ;;  %v1945_v28 = vld [vmem:[#allocation13 + $0x8] sm:$0xff] }
 0xc9b   : > { %2678 = vmatprep.subr.bf16.mxu0 %v2677_v27 }
 0xd6d   : > { %v1788_v29 = vpop.f32.mrb[4].mxu0 }
 0xd6e   : > { %v1789_v30 = vadd.f32 %v2242_v10, %v1788_v29  ;;  %v2548_v31 = vpop.f32.mrb[5].mxu0  ;;  %v1962_v10 = vld [vmem:[#allocation13 + $0x90] sm:$0xff]  ;;  %v1963_v29 = vld [vmem:[#allocation13 + $0x98] sm:$0xff] }
 0xd6f   : > { %v2681_v31 = vpack.c.bf16 %v1963_v29, %v1962_v10 }
 0xd70   : > { %v3700_v32 = vadd.f32 %v1789_v30, %v3532_v0  ;;  %v1832_v0 = vld [vmem:[#allocation11 + $0x28] sm:$0xff]  ;;  %v2679_v30 = vpack.c.bf16 %v1945_v28, %v1944_v26  ;;  %v1867_v26 = vsub.s32 1, %v3614_v46 }
 0xd71   : > { %v2649_v45 = vpack.c.bf16 %v1834_v44, %v1832_v0  ;;  %v1967_v0 = vld [vmem:[#allocation13 + $0xb8] sm:$0xff]  ;;  %v2687_v44 = vpack.c.bf16 %v1949_v41, %v1948_v40 }
 0xd72   : > { %1795 = vadd.xlane.f32.xlu0 %v3700_v32  ;;  %2680 = vmatpush3.bf16.msra.mxu0 %v2679_v30 }
 0xd73   : > { %2650 = vmatprep.subr.bf16.mxu1 %v2649_v45  ;;  %2682 = vmatprep.subr.bf16.mxu0 %v2681_v31  ;;  %v2689_v45 = vpack.c.bf16 %v1967_v0, %v1966_v43 }
 0xd74   : > { %2652 = vmatpush1.bf16.msra.mxu1 %v2651_v51  ;;  %v1968_v51 = vld [vmem:[#allocation13 + $0xc0] sm:$0xff] }
 0xd75   : > { %2654 = vmatprep.subr.bf16.mxu1 %v2653_v54  ;;  %v2693_v54 = vpack.c.bf16 %v1969_v52, %v1968_v51 }
 0xd78   : > { %2656 = vmatpush1.bf16.msra.mxu1 %v2655_v57  ;;  %v1970_v57 = vld [vmem:[#allocation13 + $0xd0] sm:$0xff] }
 0xd79   : > { %2658 = vmatprep.subr.bf16.mxu1 %v2657_v59  ;;  %v2697_v59 = vpack.c.bf16 %v1971_v50, %v1970_v57 }
 0xd7c   : > { %2660 = vmatpush1.bf16.msra.mxu1 %v2659_v61  ;;  %v1972_v61 = vld [vmem:[#allocation13 + $0xe0] sm:$0xff] }
 0xd7d   : > { %2662 = vmatprep.subr.bf16.mxu1 %v2661_v1  ;;  %v2701_v1 = vpack.c.bf16 %v1973_v62, %v1972_v61 }
 0xd80   : > { %2664 = vmatpush1.bf16.msra.mxu1 %v2663_v7 }
 0xd81   : > { %2666 = vmatprep.subr.bf16.mxu1 %v2665_v11 }
 0xd84   : > { %2668 = vmatpush1.bf16.msra.mxu1 %v2667_v3 }
 0xd85   : > { %2670 = vmatprep.subr.bf16.mxu1 %v2669_v14  ;;  %v2244_v14 = vld [vmem:[%s3841_s2] ss:$0 sm:$0xff]  ;;  %s3844_s2 = sld [smem:[#allocation31_spill]] }
 0xd88   : > { %2672 = vmatpush1.bf16.msra.mxu1 %v2671_v19  ;;  %v2703_v19 = vpack.c.bf16 %v1957_v18, %v1956_v17 }
 0xd89   : > { %2674 = vmatprep.subr.bf16.mxu1 %v2673_v20  ;;  %v1974_v20 = vld [vmem:[#allocation13 + $0xf0] sm:$0xff] }
 0xd8a   : > { %v2705_v22 = vpack.c.bf16 %v1975_v21, %v1974_v20 }
 0xd8b   : > { %s3731_s25 = scalar_lea.hbm %s3844_s2, %s2247_s11 }
 0xd8c   : > { %2676 = vmatpush1.bf16.msra.mxu1 %v2675_v23  ;;  %v1958_v23 = vld [vmem:[#allocation13 + $0x70] sm:$0xff] }
 0xd8d   : > { %v2707_v25 = vpack.c.bf16 %v1959_v24, %v1958_v23 }
 0xdff   : > { %v1796_v4 = vpop.xlane.xlu0 %1795 }
 0xe00   : > { %v1797_v33 = vmul.f32 0.0078125, %v1796_v4  ;;  %v1946_v4 = vld [vmem:[#allocation13 + $0x10] sm:$0xff] }
 0xe02   : > { %v3704_v34 = vsub.f32 %v3700_v32, %v1797_v33  ;;  %v1947_v33 = vld [vmem:[#allocation13 + $0x18] sm:$0xff] }
 0xe03   : > { %v2683_v38 = vpack.c.bf16 %v1947_v33, %v1946_v4 }
 0xe04   : > { %v1799_v36 = vmul.f32 %v3704_v34, %v3704_v34  ;;  %v1816_v13 = vmul.f32 %v2243_v12, %v3704_v34  ;;  %v1859_v34 = vld [vmem:[%s3842_s23] sm:$0x3]  ;;  %s3049_s23 = scalar_lea.vmem %s3733_s18, 128 }
 0xe05   : > { %2684 = vmatpush3.bf16.msra.mxu0 %v2683_v38  ;;  %v1864_v27 = vrot.slane %v1859_v34, %v1091_v47  ;;  %v1868_v28 = vrot.slane %v1859_v34, %v1867_v26  ;;  %p3050_p9 = scmp.ne.s32.totalorder %s3733_s18, %s3049_s23  ;;  %p3057_p2 = scmp.lt.s32.totalorder %s3055_s9, %s3049_s23 }
 0xe06   : > { %1800 = vadd.xlane.f32.xlu1 %v1799_v36  ;;  %v1964_v36 = vld [vmem:[#allocation13 + $0xa0] sm:$0xff] }
 0xe07   : > { %v2685_v39 = vpack.c.bf16 %v1965_v35, %v1964_v36  ;;  %v2245_v35 = vld [vmem:[%s3843_s13] ss:$0 sm:$0xff]  ;;  %p3051_p1 = pnand %p3050_p9, %p3845_p12  ;;  %p3058_p3 = por %p3057_p2, %p3056_p0 }
 0xe09   : > { %2686 = vmatprep.subr.bf16.mxu0 %v2685_v39  ;;  %p3052_p13 = pneg %p3051_p1 }
 0xe0a   : > { %2688 = vmatpush3.bf16.msra.mxu0 %v2687_v44 }
 0xe0b   : > { %2690 = vmatprep.subr.bf16.mxu0 %v2689_v45  ;;  %p3059_p4 = pnand %p3058_p3, %p3052_p13 }
 0xe0e   : > { %2692 = vmatpush3.bf16.msra.mxu0 %v2691_v53 }
 0xe0f   : > { %2694 = vmatprep.subr.bf16.mxu0 %v2693_v54 }
 0xe12   : > { %2696 = vmatpush3.bf16.msra.mxu0 %v2695_v58 }
 0xe13   : > { %2698 = vmatprep.subr.bf16.mxu0 %v2697_v59 }
 0xe16   : > { %2700 = vmatpush3.bf16.msra.mxu0 %v2699_v63 }
 0xe17   : > { %2702 = vmatprep.subr.bf16.mxu0 %v2701_v1 }
 0xe1a   : > { %2704 = vmatpush3.bf16.msra.mxu0 %v2703_v19 }
 0xe1b   : > { %2706 = vmatprep.subr.bf16.mxu0 %v2705_v22 }
 0xe1e   : > { %2708 = vmatpush3.bf16.msra.mxu0 %v2707_v25 }
 0xe93   : > { %v1801_v2 = vpop.xlane.xlu1 %1800 }
 0xe94   : > { %v1802_v5 = vmul.f32 0.007874016, %v1801_v2 }
 0xe96   : > { %2847 = vrsqrt.f32 %v1802_v5  ;;  %vm1805_vm9 = vcmp.eq.f32.partialorder %v1802_v5, inf  ;;  %v1808_v8 = vand.u32 2147483648, %v1802_v5  ;;  %vm1807_vm10 = vcmp.eq.f32.partialorder %v1802_v5, 0.0 }
 0xea0   : > { %v2848_v6 = vpop.eup %2847 }
 0xea1   : > { %v1804_v7 = vmul.f32 %v2848_v6, %v1802_v5 }
 0xea3   : > { %v1806_v9 = vsel %vm1805_vm9, %v1802_v5, %v1804_v7 }
 0xea4   : > { %v1809_v37 = vsel %vm1807_vm10, %v1808_v8, %v1806_v9 }
 0xea5   : > { %v1817_v11 = vadd.f32 1e-06, %v1809_v37 }
 0xea7   : > { %2849 = vrcp.f32 %v1817_v11 }
 0xeb1   : > { %v2850_v3 = vpop.eup %2849 }
 0xeb2   : > { %v1819_v15 = vmul.f32 %v2850_v3, %v1816_v13 }
 0xeb4   : > { %v1826_v16 = vadd.f32 %v2244_v14, %v1819_v15 }
 0xeb6   : > { %1936 = vmatmul.mubr.f32.vlgmr.msra.gmra.mrb[18].mxu1 %v1826_v16 }
 0xf89   : > { %v1937_v10 = vpop.f32.mrb[18].mxu1 }
 0xf8a   : > { %v1938_v29 = vadd.f32 %v1937_v10, %v1864_v27  ;;  %v1939_v30 = vpop.f32.mrb[19].mxu1 }
 0xf8b   : > { %v1940_v31 = vadd.f32 %v1939_v30, %v1868_v28 }
 0xf8c   : > { %v1942_v33 = vmax.f32 %v1938_v29, 0.0 }
 0xf8d   : > { %v1943_v4 = vmax.f32 %v1940_v31, 0.0 }
 0xf8f   : > { %2047 = vmatprep.mubr.f32.mxu0 %v1943_v4 }
 0xf90   : > { %2048 = vmatmul.mubr.f32.vlgmr.msra.gmra.mrb[6].mxu0 %v1942_v33 }
0x1063   : > { %v2366_v36 = vpop.f32.mrb[6].mxu0 }
0x1064   : > { %v2367_v38 = vpop.f32.mrb[7].mxu0 }
0x1065   : > { %v2368_v46 = vadd.f32 %v2367_v38, %v2366_v36 }
0x1067   : > { %v2050_v47 = vadd.f32 %v2368_v46, %v2245_v35 }
0x1069   : > { %v2053_v39 = vadd.f32 %v2050_v47, %v3700_v32 }
0x106b   : > { %2054 = vst [vmem:[%s688_s20] sm:$0xff] %v2053_v39 }
0x106c   : > { %3062 = shalt.err (!%p3059_p4)
}
0x106d   : > { %s3063_s22 = scalar_lea.hbm %s3731_s25, 128  ;;  %s3067_s11 = scalar_lea.hbm %s3844_s2, 256 }
0x106e   : > { %p3064_p10 = scmp.ne.s32.totalorder %s3731_s25, %s3063_s22  ;;  %p3068_p5 = scmp.lt.u32.totalorder %s3731_s25, %s3844_s2 }
0x106f   : > { %p3069_p7 = scmp.lt.u32.totalorder %s3067_s11, %s3063_s22  ;;  %p3071_p9 = scmp.lt.u32.totalorder %s3063_s22, %s3731_s25 }
0x1070   : > { %p3065_p11 = pnand %p3064_p10, %p3845_p12 }
0x1071   : > { %p3070_p6 = por %p3069_p7, %p3068_p5 }
0x1072   : > { %p3066_p8 = pneg %p3065_p11 }
0x1073   : > { %p3072_p1 = por %p3071_p9, %p3070_p6 }
0x1075   : > { %p3073_p13 = pnand %p3072_p1, %p3066_p8 }
0x1077   : > { %3076 = shalt.err (!%p3073_p13)
}
0x1078   : > { %2735 = dma.vmem_to_hbm [thread:$0]  (%p3845_p12), %s3733_s18, 128, %s3731_s25, %s2056_s15  }
0x1079 PF: > { %s2081_s17 = sand.u32 1, %s3115_s27   ;;  %p3846_p0 = scmp.ne.s32.totalorder %s3826_s19, 0 }
0x107a   : > { %p3847_p2 = scmp.ge.s32.totalorder %s3127_s30, 2  ;;  %s2082_s23 = scalar_lea.sflag [#allocation4], %s2081_s17 }
0x107c   : > { %p2761_p3 = pnand %p3847_p2, %p3846_p0 }
0x107e   : > { %3110 = dma.done.wait (!%p2761_p3), %s2082_s23, 128  }
0x107f   : > { %3112 = vsyncadd (!%p2761_p3), %s2082_s23, 4294967168  ;;  %p34_p4 = scmp.ge.s32.totalorder %s3434_s21, 4   ;;  %s3848_s27 = smov %s3119_s28 }
0x1080   : > { %s3849_s28 = smov %s3123_s29  ;;  %s3850_s29 = smov %s3445_s24 }
0x1081   : > { %s3851_s30 = smov %s3434_s21  ;;  %36 = sbr.rel (!%p34_p4) target bundleno = 21 (0x15), region = 164 }
0x1088   :  { %2087 = vsyncpa [#allocation3], 1 }
0x1089   :  { %2089 = vsyncpa [#allocation3 + $0x1], 1 }
0x108a   :  { %2090 = vsyncpa [#allocation6], 1 }
0x108b   :  { %2091 = vsyncpa [#allocation9], 1 }
0x108c   :  { %2092 = vsyncpa [#allocation12], 1 }
0x108d   :  { %2093 = vsyncpa [#allocation4], 1 }
0x108e   :  { %2095 = vsyncpa [#allocation4 + $0x1], 1 }

</bundles_post_ra>
